<compile_context>
chip_gen: v6e
topology: v6e:2x2x1
jax: 0.10.0
libtpu: 0.0.40
codegen_flags: <defaults>
</compile_context>

<pallas_src>
import functools

import jax
import jax.numpy as jnp
from jax.experimental import pallas as pl
from jax.experimental.pallas import tpu as pltpu

IN_FEATURES = 28 * 28      # 784
HIDDEN = 50
HIDDEN_PAD = 128           # lane-dense padded hidden width
OUT_FEATURES = 10
OUT_PAD = 128              # lane-dense padded output width


def _mlp_kernel(x_ref, w1_ref, b1_ref, w2_ref, b2_ref, o_ref):
    # In-kernel f32 -> bf16 cast of x (hides under the input DMA; saves a whole
    # wrapper-side read+write pass over x in HBM).
    x = x_ref[...].astype(jnp.bfloat16)                       # (TB, 784) bf16
    h = jnp.dot(x, w1_ref[...],
                preferred_element_type=jnp.float32)           # (TB, 128) f32 acc
    h = jnp.maximum(h + b1_ref[...], 0.0)                     # bias + ReLU (f32 VPU)
    o = jnp.dot(h.astype(jnp.bfloat16), w2_ref[...],
                preferred_element_type=jnp.float32)           # (TB, 128) f32 acc
    o_ref[...] = o + b2_ref[...]                              # lane-dense store


def prepare_params(w1, b1, w2, b2):
    """Pad hidden 50->128 and out 10->128, cast weights to bf16 (once, outside kernel).

    w1: (50, 784)  fc1.weight     b1: (50,)  fc1.bias
    w2: (10, 50)   fc2.weight     b2: (10,)  fc2.bias
    Padded hidden units are exact zeros through bias+ReLU; padded output lanes are
    exact zeros (zero w2 columns, zero b2 entries), so [:, :10] is exact.
    """
    w1_p = jnp.zeros((IN_FEATURES, HIDDEN_PAD), jnp.float32).at[:, :HIDDEN].set(w1.T)
    b1_p = jnp.zeros((1, HIDDEN_PAD), jnp.float32).at[:, :HIDDEN].set(b1)
    w2_p = jnp.zeros((HIDDEN_PAD, OUT_PAD), jnp.float32).at[:HIDDEN, :OUT_FEATURES].set(w2.T)
    b2_p = jnp.zeros((1, OUT_PAD), jnp.float32).at[:, :OUT_FEATURES].set(b2)
    return (w1_p.astype(jnp.bfloat16), b1_p,
            w2_p.astype(jnp.bfloat16), b2_p)


def _pick_tile(b, tile_b):
    """Sublane-aligned batch tile; keeps >=2 grid steps when batch allows (v7x)."""
    b_round = max(8, ((b + 7) // 8) * 8)
    tile = min(max(8, (tile_b // 8) * 8), b_round)   # always a multiple of 8
    if b_round >= 2 * tile:
        return tile                                  # already >=2 grid steps
    half = b_round // 2
    if half >= 8 and half % 8 == 0:
        tile = half                                  # exactly 2 steps, no extra padding
    return tile


@functools.partial(jax.jit, static_argnames=("tile_b",))
def net_forward(x, w1_p, b1_p, w2_p, b2_p, *, tile_b=512):
    """Pallas implementation of Net.forward, batched.

    x: (B, 1, 28, 28) f32.  Returns (B, 10) f32.
    """
    assert x.shape[1:] == (1, 28, 28), "expected (B, 1, 28, 28) input"
    b = x.shape[0]
    x_flat = x.reshape(b, IN_FEATURES)          # per-sample flatten (B=1 == view(1,784))

    tile = _pick_tile(b, tile_b)
    b_pad = pl.cdiv(b, tile) * tile
    if b_pad != b:
        # Only taken when b % tile != 0 (tail rows). TODO(synk): a second tiny call for
        # the remainder would avoid this copy entirely; negligible for small tails.
        x_flat = jnp.concatenate(
            [x_flat, jnp.zeros((b_pad - b, IN_FEATURES), x_flat.dtype)], axis=0)

    grid = (b_pad // tile,)

    flops = 2 * b_pad * (IN_FEATURES * HIDDEN_PAD + HIDDEN_PAD * OUT_PAD)
    bytes_accessed = (b_pad * IN_FEATURES * 4            # x read (f32)
                      + b_pad * OUT_PAD * 4              # out write (f32)
                      + IN_FEATURES * HIDDEN_PAD * 2     # w1 (bf16)
                      + HIDDEN_PAD * OUT_PAD * 2         # w2 (bf16)
                      + HIDDEN_PAD * 4 + OUT_PAD * 4)    # biases (f32)
    cost = pl.CostEstimate(flops=flops, transcendentals=0,
                           bytes_accessed=bytes_accessed)

    out = pl.pallas_call(
        _mlp_kernel,
        out_shape=jax.ShapeDtypeStruct((b_pad, OUT_PAD), jnp.float32),
        grid_spec=pltpu.PrefetchScalarGridSpec(
            num_scalar_prefetch=0,
            grid=grid,
            in_specs=[
                pl.BlockSpec((tile, IN_FEATURES), lambda i: (i, 0)),          # x tile (f32)
                pl.BlockSpec((IN_FEATURES, HIDDEN_PAD), lambda i: (0, 0)),    # w1 (resident)
                pl.BlockSpec((1, HIDDEN_PAD), lambda i: (0, 0)),              # b1 (resident)
                pl.BlockSpec((HIDDEN_PAD, OUT_PAD), lambda i: (0, 0)),        # w2 (resident)
                pl.BlockSpec((1, OUT_PAD), lambda i: (0, 0)),                 # b2 (resident)
            ],
            out_specs=pl.BlockSpec((tile, OUT_PAD), lambda i: (i, 0)),        # lane-dense
        ),
        compiler_params=pltpu.CompilerParams(
            dimension_semantics=("parallel",),   # shard batch tiles across v7x's 2 TCs
            vmem_limit_bytes=32 << 20,           # raises v5e's 16 MiB default scoped VMEM
        ),
        cost_estimate=cost,
    )(x_flat, w1_p, b1_p, w2_p, b2_p)

    return out[:b, :OUT_FEATURES]


def init_params(key):
    """Deterministic init mimicking PyTorch's default Linear init (U[-1/sqrt(fan_in), +])."""
    k1, k2, k3, k4 = jax.random.split(key, 4)
    lim1 = 1.0 / jnp.sqrt(784.0)
    lim2 = 1.0 / jnp.sqrt(50.0)
    w1 = jax.random.uniform(k1, (HIDDEN, IN_FEATURES), jnp.float32, -lim1, lim1)
    b1 = jax.random.uniform(k2, (HIDDEN,), jnp.float32, -lim1, lim1)
    w2 = jax.random.uniform(k3, (OUT_FEATURES, HIDDEN), jnp.float32, -lim2, lim2)
    b2 = jax.random.uniform(k4, (OUT_FEATURES,), jnp.float32, -lim2, lim2)
    return w1, b1, w2, b2


def _reference(x, w1_p, b1_p, w2_p, b2_p):
    """Plain-JAX reference with identical numerics (bf16 x/weights, f32 accum)."""
    b = x.shape[0]
    x_bf = x.reshape(b, IN_FEATURES).astype(jnp.bfloat16)
    h = jnp.maximum(
        jnp.dot(x_bf, w1_p, preferred_element_type=jnp.float32) + b1_p, 0.0)
    o = jnp.dot(h.astype(jnp.bfloat16), w2_p,
                preferred_element_type=jnp.float32) + b2_p
    return o[:, :OUT_FEATURES]


if __name__ == "__main__":
    key = jax.random.PRNGKey(0)
    kx, kx2, kp = jax.random.split(key, 3)

    w1, b1, w2, b2 = init_params(kp)
    w1_p, b1_p, w2_p, b2_p = prepare_params(w1, b1, w2, b2)

    # Main batched case: B=512 -> tile=256, 2 grid steps (keeps both v7x TCs busy),
    # no batch padding, no wrapper-side cast of x.
    B = 512
    x = jax.random.normal(kx, (B, 1, 28, 28), dtype=jnp.float32)
    out = net_forward(x, w1_p, b1_p, w2_p, b2_p, tile_b=512)
    out = jax.block_until_ready(out)
    assert out.shape == (B, OUT_FEATURES)

    ref = _reference(x, w1_p, b1_p, w2_p, b2_p)
    err = jnp.max(jnp.abs(out - ref))
    assert jnp.allclose(out, ref, atol=2e-3, rtol=2e-3), f"max abs err {err}"

    # Sanity vs. full-f32 math (bf16 quantization only; loose tolerance).
    ref_f32 = jnp.maximum(x.reshape(B, IN_FEATURES) @ w1.T + b1, 0.0) @ w2.T + b2
    assert jnp.allclose(out, ref_f32, atol=5e-2, rtol=5e-2)

    # Ragged-tail case: B=3 exercises the batch-padding path (single 8-row tile).
    x_small = jax.random.normal(kx2, (3, 1, 28, 28), dtype=jnp.float32)
    out_small = jax.block_until_ready(net_forward(x_small, w1_p, b1_p, w2_p, b2_p))
    ref_small = _reference(x_small, w1_p, b1_p, w2_p, b2_p)
    assert out_small.shape == (3, OUT_FEATURES)
    assert jnp.allclose(out_small, ref_small, atol=2e-3, rtol=2e-3)

    print("KERNEL_OK")
</pallas_src>

<mosaic_0001>
module attributes {stable_mosaic.version = 11 : i64} {
  func.func @_mlp_kernel(%arg0: i32, %arg1: memref<256x784xf32, #tpu.memory_space<vmem>>, %arg2: memref<784x128xbf16, #tpu.memory_space<vmem>>, %arg3: memref<1x128xf32, #tpu.memory_space<vmem>>, %arg4: memref<128x128xbf16, #tpu.memory_space<vmem>>, %arg5: memref<1x128xf32, #tpu.memory_space<vmem>>, %arg6: memref<256x128xf32, #tpu.memory_space<vmem>>) attributes {dimension_semantics = [#tpu.dimension_semantics<parallel>], iteration_bounds = array<i64: 2>, scalar_prefetch = 0 : i64, scratch_operands = 0 : i64, tpu.core_type = #tpu.core_type<tc>, window_params = [{transform_indices = @transform_0, window_bounds = array<i64: 256, 784>}, {pipeline_mode = #tpu.pipeline_mode<synchronous>, transform_indices = @transform_1, window_bounds = array<i64: 784, 128>}, {pipeline_mode = #tpu.pipeline_mode<synchronous>, transform_indices = @transform_2, window_bounds = array<i64: 1, 128>}, {pipeline_mode = #tpu.pipeline_mode<synchronous>, transform_indices = @transform_3, window_bounds = array<i64: 128, 128>}, {pipeline_mode = #tpu.pipeline_mode<synchronous>, transform_indices = @transform_4, window_bounds = array<i64: 1, 128>}, {transform_indices = @transform_5, window_bounds = array<i64: 256, 128>}]} {
    %c0 = arith.constant 0 : index
    %c0_0 = arith.constant 0 : index
    %0 = vector.load %arg1[%c0, %c0_0] : memref<256x784xf32, #tpu.memory_space<vmem>>, vector<256x784xf32>
    %1 = arith.truncf %0 : vector<256x784xf32> to vector<256x784xbf16>
    %c0_1 = arith.constant 0 : index
    %c0_2 = arith.constant 0 : index
    %2 = vector.load %arg2[%c0_1, %c0_2] : memref<784x128xbf16, #tpu.memory_space<vmem>>, vector<784x128xbf16>
    %cst = arith.constant dense<0.000000e+00> : vector<256x128xf32>
    %3 = tpu.matmul %1, %2, %cst {dimension_numbers = #tpu.dot_dimension_numbers<[1], [0], [0], [1], [0, 0, 1, 1], [], []>} : vector<256x784xbf16>, vector<784x128xbf16>, vector<256x128xf32> -> vector<256x128xf32>
    %c0_3 = arith.constant 0 : index
    %c0_4 = arith.constant 0 : index
    %4 = vector.load %arg3[%c0_3, %c0_4] : memref<1x128xf32, #tpu.memory_space<vmem>>, vector<1x128xf32>
    %5 = vector.broadcast %4 : vector<1x128xf32> to vector<256x128xf32>
    %6 = arith.addf %3, %5 : vector<256x128xf32>
    %cst_5 = arith.constant 0.000000e+00 : f32
    %7 = vector.broadcast %cst_5 : f32 to vector<256x128xf32>
    %8 = arith.maximumf %6, %7 : vector<256x128xf32>
    %9 = arith.truncf %8 : vector<256x128xf32> to vector<256x128xbf16>
    %c0_6 = arith.constant 0 : index
    %c0_7 = arith.constant 0 : index
    %10 = vector.load %arg4[%c0_6, %c0_7] : memref<128x128xbf16, #tpu.memory_space<vmem>>, vector<128x128xbf16>
    %cst_8 = arith.constant dense<0.000000e+00> : vector<256x128xf32>
    %11 = tpu.matmul %9, %10, %cst_8 {dimension_numbers = #tpu.dot_dimension_numbers<[1], [0], [0], [1], [0, 0, 1, 1], [], []>} : vector<256x128xbf16>, vector<128x128xbf16>, vector<256x128xf32> -> vector<256x128xf32>
    %c0_9 = arith.constant 0 : index
    %c0_10 = arith.constant 0 : index
    %12 = vector.load %arg5[%c0_9, %c0_10] : memref<1x128xf32, #tpu.memory_space<vmem>>, vector<1x128xf32>
    %13 = vector.broadcast %12 : vector<1x128xf32> to vector<256x128xf32>
    %14 = arith.addf %11, %13 : vector<256x128xf32>
    %c0_11 = arith.constant 0 : index
    %c0_12 = arith.constant 0 : index
    %15 = vector.load %arg6[%c0_11, %c0_12] : memref<256x128xf32, #tpu.memory_space<vmem>>, vector<256x128xf32>
    tpu.vector_store %arg6[%c0_11, %c0_12], %14 {strides = array<i32>} : memref<256x128xf32, #tpu.memory_space<vmem>>, vector<256x128xf32>,
    return
  }
  func.func @transform_0(%arg0: i32) -> (i32, i32) {
    %c0_i32 = arith.constant 0 : i32
    %c0_i32_0 = arith.constant 0 : i32
    return %arg0, %c0_i32 : i32, i32
  }
  func.func @transform_1(%arg0: i32) -> (i32, i32) {
    %c0_i32 = arith.constant 0 : i32
    %c0_i32_0 = arith.constant 0 : i32
    %c0_i32_1 = arith.constant 0 : i32
    return %c0_i32, %c0_i32_0 : i32, i32
  }
  func.func @transform_2(%arg0: i32) -> (i32, i32) {
    %c0_i32 = arith.constant 0 : i32
    %c0_i32_0 = arith.constant 0 : i32
    %c0_i32_1 = arith.constant 0 : i32
    return %c0_i32, %c0_i32_0 : i32, i32
  }
  func.func @transform_3(%arg0: i32) -> (i32, i32) {
    %c0_i32 = arith.constant 0 : i32
    %c0_i32_0 = arith.constant 0 : i32
    %c0_i32_1 = arith.constant 0 : i32
    return %c0_i32, %c0_i32_0 : i32, i32
  }
  func.func @transform_4(%arg0: i32) -> (i32, i32) {
    %c0_i32 = arith.constant 0 : i32
    %c0_i32_0 = arith.constant 0 : i32
    %c0_i32_1 = arith.constant 0 : i32
    return %c0_i32, %c0_i32_0 : i32, i32
  }
  func.func @transform_5(%arg0: i32) -> (i32, i32) {
    %c0_i32 = arith.constant 0 : i32
    %c0_i32_0 = arith.constant 0 : i32
    return %arg0, %c0_i32 : i32, i32
  }
}

</mosaic_0001>

<bundles_post_ra>
// kernel: net_forward.1
= control target key start
LH: loop header
LB: loop body
LE: loop exit
PB: predicated region body
PF: predicated region fallthrough
CT: control target
= control target key end

     0   :  { %s2677_s18 = smov 0   ;;  %s3317_s0 = inlined_call_operand.vmem [shape: f32[512,784], index: 0, kind: input, shape index: {}]   ;;  %s3318_s1 = inlined_call_operand.vmem [shape: bf16[784,128], index: 1, kind: input, shape index: {}]   ;;  %s3319_s2 = inlined_call_operand.vmem [shape: f32[1,128], index: 2, kind: input, shape index: {}]   ;;  %s3320_s3 = inlined_call_operand.vmem [shape: bf16[128,128], index: 3, kind: input, shape index: {}]   ;;  %s3321_s4 = inlined_call_operand.vmem [shape: f32[1,128], index: 4, kind: input, shape index: {}]   ;;  %s3322_s5 = inlined_call_operand.vmem [shape: f32[512,128], index: 5, kind: output, shape index: {}]  }
   0x1 LB: > { %s2028_s19 = sadd.s32 4294967295, %s2645_s18   ;;  %p2032_p0 = scmp.ge.s32.totalorder %s2645_s18, 1  ;;  %s2645_s18 = sphi %s2677_s18, %s15_s18  }
   0x2   : > { %p189_p1 = scmp.lt.s32.totalorder %s2645_s18, 3 }
   0x4   : > { %p190_p2 = pnand %p2032_p0, %p189_p1 }
   0x5   : > { %s2033_s25 = sshll.u32 (!%p190_p2), %s2028_s19, 5 }
   0x6   : > { %193 = sbr.rel (%p190_p2) target bundleno = 703 (0x2bf), region = 40  ;;  %p219_p3 = scmp.lt.s32.totalorder (!%p190_p2), %s2033_s25, 63 }
   0xb   : > { %v2582_v0 = vld [vmem:[%s3318_s1 + $0x78] sm:$0xff]   ;;  %v2586_v4 = vld [vmem:[%s3318_s1 + $0x70] sm:$0xff]   ;;  %v2590_v8 = vld [vmem:[%s3318_s1 + $0x68] sm:$0xff]   ;;  %s3324_s25 = smov (!%p219_p3, %s2033_s25), 63  ;;  %vm967_vm0 = vcmask 130048  }
   0xc   : > { %v2583_v1 = vld [vmem:[%s3318_s1 + $0x38] sm:$0xff]   ;;  %2114 = vmatprep.subr.bf16.mxu0 %v2582_v0  ;;  %v2587_v5 = vld [vmem:[%s3318_s1 + $0x30] sm:$0xff]   ;;  %v2591_v9 = vld [vmem:[%s3318_s1 + $0x28] sm:$0xff]   ;;  %s2573_s24 = smul.u32 56, %s3324_s25 }
   0xd   : > { %v2584_v2 = vld [vmem:[%s3318_s1 + $0xf8] sm:$0xff]   ;;  %2115 = vmatpush3.bf16.msra.mxu0 %v2583_v1  ;;  %v2588_v6 = vld [vmem:[%s3318_s1 + $0xf0] sm:$0xff]   ;;  %v2592_v10 = vld [vmem:[%s3318_s1 + $0xe8] sm:$0xff]  }
   0xe   : > { %v2585_v3 = vld [vmem:[%s3318_s1 + $0xb8] sm:$0xff]   ;;  %2226 = vmatprep.subr.bf16.mxu1 %v2584_v2  ;;  %2116 = vmatprep.subr.bf16.mxu0 %v2586_v4  ;;  %v2589_v7 = vld [vmem:[%s3318_s1 + $0xb0] sm:$0xff]   ;;  %v2593_v11 = vld [vmem:[%s3318_s1 + $0xa8] sm:$0xff]   ;;  %s2780_s10 = scalar_lea.vmem %s3317_s0, %s2573_s24 }
   0xf   : > { %2227 = vmatpush3.bf16.msra.mxu1 %v2585_v3  ;;  %v2594_v12 = vld [vmem:[%s3318_s1 + $0x60] sm:$0xff]   ;;  %v2598_v16 = vld [vmem:[%s3318_s1 + $0x58] sm:$0xff]   ;;  %v2602_v20 = vld [vmem:[%s3318_s1 + $0x50] sm:$0xff]  }
  0x10   : > { %2228 = vmatprep.subr.bf16.mxu1 %v2588_v6  ;;  %v2595_v13 = vld [vmem:[%s3318_s1 + $0x20] sm:$0xff]   ;;  %v2599_v17 = vld [vmem:[%s3318_s1 + $0x18] sm:$0xff]   ;;  %v2603_v21 = vld [vmem:[%s3318_s1 + $0x10] sm:$0xff]  }
  0x11   : > { %2117 = vmatpush3.bf16.msra.mxu0 %v2587_v5  ;;  %v2596_v14 = vld [vmem:[%s3318_s1 + $0xe0] sm:$0xff]   ;;  %v2600_v18 = vld [vmem:[%s3318_s1 + $0xd8] sm:$0xff]   ;;  %v2604_v22 = vld [vmem:[%s3318_s1 + $0xd0] sm:$0xff]  }
  0x12   : > { %2118 = vmatprep.subr.bf16.mxu0 %v2590_v8  ;;  %v2597_v15 = vld [vmem:[%s3318_s1 + $0xa0] sm:$0xff]   ;;  %v2601_v19 = vld [vmem:[%s3318_s1 + $0x98] sm:$0xff]   ;;  %v2605_v23 = vld [vmem:[%s3318_s1 + $0x90] sm:$0xff]  }
  0x13   : > { %2229 = vmatpush3.bf16.msra.mxu1 %v2589_v7  ;;  %v2606_v24 = vld [vmem:[%s3318_s1 + $0x48] sm:$0xff]   ;;  %v2610_v28 = vld [vmem:[%s3318_s1 + $0x40] sm:$0xff]   ;;  %v239_v36 = vld [vmem:[%s2780_s10 + $0x38] sm:$0xff] }
  0x14   : > { %2230 = vmatprep.subr.bf16.mxu1 %v2592_v10  ;;  %v2607_v25 = vld [vmem:[%s3318_s1 + $0x8] sm:$0xff]   ;;  %v2611_v29 = vld [vmem:[%s3318_s1] sm:$0xff]   ;;  %v2614_v38 = vld [vmem:[%s3318_s1 + $0x178] sm:$0xff]  }
  0x15   : > { %2119 = vmatpush3.bf16.msra.mxu0 %v2591_v9  ;;  %v2608_v26 = vld [vmem:[%s3318_s1 + $0xc8] sm:$0xff]   ;;  %v2612_v30 = vld [vmem:[%s3318_s1 + $0xc0] sm:$0xff]   ;;  %v235_v39 = vld [vmem:[%s2780_s10 + $0x18] sm:$0xff] }
  0x16   : > { %2120 = vmatprep.subr.bf16.mxu0 %v2594_v12  ;;  %v2609_v27 = vld [vmem:[%s3318_s1 + $0x88] sm:$0xff]   ;;  %v240_v32 = vld [vmem:[%s2780_s10 + $0x40] sm:$0xff]  ;;  %v242_v40 = vld [vmem:[%s2780_s10 + $0x50] sm:$0xff] }
  0x17   : > { %2231 = vmatpush3.bf16.msra.mxu1 %v2593_v11  ;;  %v233_v31 = vld [vmem:[%s2780_s10 + $0x8] sm:$0xff]  ;;  %v2613_v34 = vld [vmem:[%s3318_s1 + $0x80] sm:$0xff]   ;;  %v459_v41 = vpack.c.bf16 %v242_v40, %v235_v39  ;;  %v2615_v42 = vld [vmem:[%s3318_s1 + $0x138] sm:$0xff]  }
  0x18   : > { %2232 = vmatprep.subr.bf16.mxu1 %v2596_v14  ;;  %v457_v33 = vpack.c.bf16 %v240_v32, %v233_v31  ;;  %v232_v35 = vld [vmem:[%s2780_s10] sm:$0xff]  ;;  %v234_v43 = vld [vmem:[%s2780_s10 + $0x10] sm:$0xff]  ;;  %v241_v44 = vld [vmem:[%s2780_s10 + $0x48] sm:$0xff] }
  0x19   : > { %2121 = vmatpush3.bf16.msra.mxu0 %v2595_v13  ;;  %v456_v37 = vpack.c.bf16 %v239_v36, %v232_v35  ;;  %v247_v45 = vld [vmem:[%s2780_s10 + $0x78] sm:$0xff]  ;;  %1209 = vmatprep.mubr.bf16.mxu1 %v459_v41  ;;  %v458_v46 = vpack.c.bf16 %v241_v44, %v234_v43  ;;  %v254_v47 = vld [vmem:[%s2780_s10 + $0xb0] sm:$0xff]  ;;  %v253_v49 = vld [vmem:[%s2780_s10 + $0xa8] sm:$0xff] }
  0x1a   : > { %2122 = vmatprep.subr.bf16.mxu0 %v2598_v16  ;;  %1048 = vmatprep.mubr.bf16.mxu0 %v457_v33  ;;  %v246_v48 = vld [vmem:[%s2780_s10 + $0x70] sm:$0xff]  ;;  %v464_v50 = vpack.c.bf16 %v254_v47, %v247_v45  ;;  %v249_v51 = vld [vmem:[%s2780_s10 + $0x88] sm:$0xff]  ;;  %v256_v52 = vld [vmem:[%s2780_s10 + $0xc0] sm:$0xff] }
  0x1b   : > { %2233 = vmatpush3.bf16.msra.mxu1 %v2597_v15  ;;  %v466_v53 = vpack.c.bf16 %v256_v52, %v249_v51  ;;  %v261_v54 = vld [vmem:[%s2780_s10 + $0xe8] sm:$0xff]  ;;  %v268_v55 = vld [vmem:[%s2780_s10 + $0x120] sm:$0xff]  ;;  %v463_v56 = vpack.c.bf16 %v253_v49, %v246_v48  ;;  %v255_v58 = vld [vmem:[%s2780_s10 + $0xb8] sm:$0xff] }
  0x1c   : > { %2234 = vmatprep.subr.bf16.mxu1 %v2600_v18  ;;  %v248_v57 = vld [vmem:[%s2780_s10 + $0x80] sm:$0xff]  ;;  %v471_v59 = vpack.c.bf16 %v268_v55, %v261_v54  ;;  %v2616_v60 = vld [vmem:[%s3318_s1 + $0x170] sm:$0xff]   ;;  %v263_v61 = vld [vmem:[%s2780_s10 + $0xf8] sm:$0xff] }
  0x1d   : > { %2123 = vmatpush3.bf16.msra.mxu0 %v2599_v17  ;;  %v270_v62 = vld [vmem:[%s2780_s10 + $0x130] sm:$0xff]  ;;  %v465_v63 = vpack.c.bf16 %v255_v58, %v248_v57  ;;  %v260_v2 = vld [vmem:[%s2780_s10 + $0xe0] sm:$0xff]  ;;  %v267_v3 = vld [vmem:[%s2780_s10 + $0x118] sm:$0xff] }
  0x1e   : > { %2124 = vmatprep.subr.bf16.mxu0 %v2602_v20  ;;  %v2617_v0 = vld [vmem:[%s3318_s1 + $0x130] sm:$0xff]   ;;  %v473_v1 = vpack.c.bf16 %v270_v62, %v263_v61  ;;  %v275_v4 = vld [vmem:[%s2780_s10 + $0x158] sm:$0xff]  ;;  %v269_v7 = vld [vmem:[%s2780_s10 + $0x128] sm:$0xff]  ;;  %v470_v8 = vpack.c.bf16 %v267_v3, %v260_v2 }
  0x1f   : > { %2235 = vmatpush3.bf16.msra.mxu1 %v2601_v19  ;;  %v282_v5 = vld [vmem:[%s2780_s10 + $0x190] sm:$0xff]  ;;  %v2618_v9 = vld [vmem:[%s3318_s1 + $0x168] sm:$0xff]   ;;  %v284_v12 = vld [vmem:[%s2780_s10 + $0x1a0] sm:$0xff] }
  0x20   : > { %2236 = vmatprep.subr.bf16.mxu1 %v2604_v22  ;;  %v262_v6 = vld [vmem:[%s2780_s10 + $0xf0] sm:$0xff]  ;;  %v478_v10 = vpack.c.bf16 %v282_v5, %v275_v4  ;;  %v277_v11 = vld [vmem:[%s2780_s10 + $0x168] sm:$0xff]  ;;  %v276_v18 = vld [vmem:[%s2780_s10 + $0x160] sm:$0xff] }
  0x21   : > { %2125 = vmatpush3.bf16.msra.mxu0 %v2603_v21  ;;  %v2619_v13 = vld [vmem:[%s3318_s1 + $0x128] sm:$0xff]   ;;  %v472_v14 = vpack.c.bf16 %v269_v7, %v262_v6  ;;  %v480_v15 = vpack.c.bf16 %v284_v12, %v277_v11  ;;  %v274_v16 = vld [vmem:[%s2780_s10 + $0x150] sm:$0xff]  ;;  %v296_v20 = vld [vmem:[%s2780_s10 + $0x200] sm:$0xff] }
  0x22   : > { %2126 = vmatprep.subr.bf16.mxu0 %v2606_v24  ;;  %v281_v17 = vld [vmem:[%s2780_s10 + $0x188] sm:$0xff]  ;;  %v283_v21 = vld [vmem:[%s2780_s10 + $0x198] sm:$0xff]  ;;  %v298_v24 = vld [vmem:[%s2780_s10 + $0x210] sm:$0xff] }
  0x23   : > { %2237 = vmatpush3.bf16.msra.mxu1 %v2605_v23  ;;  %v289_v19 = vld [vmem:[%s2780_s10 + $0x1c8] sm:$0xff]  ;;  %v477_v22 = vpack.c.bf16 %v281_v17, %v274_v16  ;;  %v291_v23 = vld [vmem:[%s2780_s10 + $0x1d8] sm:$0xff]  ;;  %v310_v33 = vld [vmem:[%s2780_s10 + $0x270] sm:$0xff] }
  0x24   : > { %2238 = vmatprep.subr.bf16.mxu1 %v2608_v26  ;;  %v485_v26 = vpack.c.bf16 %v296_v20, %v289_v19  ;;  %v295_v31 = vld [vmem:[%s2780_s10 + $0x1f8] sm:$0xff]  ;;  %v305_v39 = vld [vmem:[%s2780_s10 + $0x248] sm:$0xff]  ;;  %v312_v40 = vld [vmem:[%s2780_s10 + $0x280] sm:$0xff] }
  0x25   : > { %2127 = vmatpush3.bf16.msra.mxu0 %v2607_v25  ;;  %v2620_v25 = vld [vmem:[%s3318_s1 + $0x160] sm:$0xff]   ;;  %v303_v32 = vld [vmem:[%s2780_s10 + $0x238] sm:$0xff]  ;;  %v494_v44 = vpack.c.bf16 %v312_v40, %v305_v39  ;;  %v302_v45 = vld [vmem:[%s2780_s10 + $0x230] sm:$0xff] }
  0x26   : > { %2128 = vmatprep.subr.bf16.mxu0 %v2610_v28  ;;  %v479_v28 = vpack.c.bf16 %v283_v21, %v276_v18  ;;  %v2622_v35 = vld [vmem:[%s3318_s1 + $0x158] sm:$0xff]   ;;  %v304_v47 = vld [vmem:[%s2780_s10 + $0x240] sm:$0xff]  ;;  %v317_v48 = vld [vmem:[%s2780_s10 + $0x2a8] sm:$0xff] }
  0x27   : > { %2239 = vmatpush3.bf16.msra.mxu1 %v2609_v27  ;;  %v2621_v27 = vld [vmem:[%s3318_s1 + $0x120] sm:$0xff]   ;;  %v2623_v41 = vld [vmem:[%s3318_s1 + $0x118] sm:$0xff]   ;;  %v326_v55 = vld [vmem:[%s2780_s10 + $0x2f0] sm:$0xff] }
  0x28   : > { %2240 = vmatprep.subr.bf16.mxu1 %v2612_v30  ;;  %v288_v30 = vld [vmem:[%s2780_s10 + $0x1c0] sm:$0xff]  ;;  %v311_v52 = vld [vmem:[%s2780_s10 + $0x278] sm:$0xff]  ;;  %v338_v62 = vld [vmem:[%s2780_s10 + $0x350] sm:$0xff] }
  0x29   : > { %2129 = vmatpush3.bf16.msra.mxu0 %v2611_v29  ;;  %v487_v29 = vpack.c.bf16 %v298_v24, %v291_v23  ;;  %v484_v36 = vpack.c.bf16 %v295_v31, %v288_v30  ;;  %v324_v49 = vld [vmem:[%s2780_s10 + $0x2e0] sm:$0xff]  ;;  %v493_v57 = vpack.c.bf16 %v311_v52, %v304_v47  ;;  %v331_v61 = vld [vmem:[%s2780_s10 + $0x318] sm:$0xff]  ;;  %v2628_v3 = vld [vmem:[%s3318_s1 + $0x108] sm:$0xff]  }
  0x2a   : > { %2338 = vmatprep.subr.bf16.mxu0 %v2614_v38  ;;  %v492_v38 = vpack.c.bf16 %v310_v33, %v303_v32  ;;  %v499_v54 = vpack.c.bf16 %v324_v49, %v317_v48  ;;  %v506_v4 = vpack.c.bf16 %v338_v62, %v331_v61  ;;  %v333_v5 = vld [vmem:[%s2780_s10 + $0x328] sm:$0xff]  ;;  %v340_v6 = vld [vmem:[%s2780_s10 + $0x360] sm:$0xff]  ;;  %v339_v16 = vld [vmem:[%s2780_s10 + $0x358] sm:$0xff] }
  0x2b   : > { %2241 = vmatpush3.bf16.msra.mxu1 %v2613_v34  ;;  %v290_v34 = vld [vmem:[%s2780_s10 + $0x1d0] sm:$0xff]  ;;  %v345_v11 = vld [vmem:[%s2780_s10 + $0x388] sm:$0xff]  ;;  %v352_v12 = vld [vmem:[%s2780_s10 + $0x3c0] sm:$0xff] }
  0x2c   : > { %1049 = vmatmul.mubr.bf16.vlgmr.msra.gmra.mxu0 %v456_v37  ;;  %v297_v37 = vld [vmem:[%s2780_s10 + $0x208] sm:$0xff]  ;;  %v2630_v17 = vld [vmem:[%s3318_s1 + $0x100] sm:$0xff]   ;;  %v513_v18 = vpack.c.bf16 %v352_v12, %v345_v11  ;;  %v347_v19 = vld [vmem:[%s2780_s10 + $0x398] sm:$0xff] }
  0x2d   : > { %2339 = vmatpush3.bf16.msra.mxu0 %v2615_v42  ;;  %1056 = vmatprep.mubr.bf16.mxu0 %v464_v50  ;;  %v2624_v42 = vld [vmem:[%s3318_s1 + $0x180] sm:$0xff]   ;;  %v486_v43 = vpack.c.bf16 %v297_v37, %v290_v34  ;;  %v2625_v50 = vld [vmem:[%s3318_s1 + $0x150] sm:$0xff]   ;;  %v351_v24 = vld [vmem:[%s2780_s10 + $0x3b8] sm:$0xff] }
  0x2e   : > { %1210 = vmatmul.mubr.bf16.vlgmr.msra.gmra.mxu1 %v458_v46  ;;  %2340 = vmatprep.subr.bf16.mxu0 %v2616_v60  ;;  %v309_v46 = vld [vmem:[%s2780_s10 + $0x268] sm:$0xff]  ;;  %v323_v60 = vld [vmem:[%s2780_s10 + $0x2d8] sm:$0xff]  ;;  %v354_v20 = vld [vmem:[%s2780_s10 + $0x3d0] sm:$0xff] }
  0x2f   : > { %1217 = vmatprep.mubr.bf16.mxu1 %v466_v53  ;;  %2491 = vmatprep.subr.bf16.mxu1 %v2624_v42  ;;  %v491_v51 = vpack.c.bf16 %v309_v46, %v302_v45  ;;  %v319_v53 = vld [vmem:[%s2780_s10 + $0x2b8] sm:$0xff]  ;;  %v344_v23 = vld [vmem:[%s2780_s10 + $0x380] sm:$0xff]  ;;  %v361_v31 = vld [vmem:[%s2780_s10 + $0x408] sm:$0xff] }
  0x30   : > { %2492 = vmatpush3.bf16.msra.mxu1 %v2624_v42  ;;  %v501_v58 = vpack.c.bf16 %v326_v55, %v319_v53  ;;  %v368_v32 = vld [vmem:[%s2780_s10 + $0x440] sm:$0xff]  ;;  %v373_v37 = vld [vmem:[%s2780_s10 + $0x468] sm:$0xff]  ;;  %v379_v48 = vld [vmem:[%s2780_s10 + $0x498] sm:$0xff] }
  0x31   : > { %2341 = vmatpush3.bf16.msra.mxu0 %v2617_v0  ;;  %v325_v0 = vld [vmem:[%s2780_s10 + $0x2e8] sm:$0xff]  ;;  %v522_v34 = vpack.c.bf16 %v368_v32, %v361_v31  ;;  %v360_v40 = vld [vmem:[%s2780_s10 + $0x400] sm:$0xff]  ;;  %v387_v49 = vld [vmem:[%s2780_s10 + $0x4d8] sm:$0xff] }
  0x32   : > { %2342 = vmatprep.subr.bf16.mxu0 %v2618_v9  ;;  %v508_v9 = vpack.c.bf16 %v340_v6, %v333_v5  ;;  %v372_v47 = vld [vmem:[%s2780_s10 + $0x460] sm:$0xff]  ;;  %v381_v52 = vld [vmem:[%s2780_s10 + $0x4a8] sm:$0xff]  ;;  %v402_v12 = vld [vmem:[%s2780_s10 + $0x550] sm:$0xff] }
  0x33   : > { %v526_v53 = vpack.c.bf16 %v379_v48, %v372_v47  ;;  %v389_v55 = vld [vmem:[%s2780_s10 + $0x4e8] sm:$0xff]  ;;  %v408_v62 = vld [vmem:[%s2780_s10 + $0x580] sm:$0xff]  ;;  %v435_v32 = vld [vmem:[%s2780_s10 + $0x658] sm:$0xff] }
  0x34   : > { %1057 = vmatmul.mubr.bf16.gmra.mxu0 %v463_v56  ;;  %v2626_v56 = vld [vmem:[%s3318_s1 + $0x110] sm:$0xff]   ;;  %v401_v61 = vld [vmem:[%s2780_s10 + $0x548] sm:$0xff]  ;;  %v428_v31 = vld [vmem:[%s2780_s10 + $0x620] sm:$0xff] }
  0x35   : > { %1064 = vmatprep.mubr.bf16.mxu0 %v471_v59  ;;  %2343 = vmatpush3.bf16.msra.mxu0 %v2619_v13  ;;  %v316_v59 = vld [vmem:[%s2780_s10 + $0x2a0] sm:$0xff] }
  0x36   : > { %1218 = vmatmul.mubr.bf16.gmra.mxu1 %v465_v63  ;;  %2344 = vmatprep.subr.bf16.mxu0 %v2620_v25  ;;  %v318_v63 = vld [vmem:[%s2780_s10 + $0x2b0] sm:$0xff]  ;;  %v498_v2 = vpack.c.bf16 %v323_v60, %v316_v59  ;;  %v2629_v13 = vld [vmem:[%s3318_s1 + $0x140] sm:$0xff]   ;;  %v359_v25 = vld [vmem:[%s2780_s10 + $0x3f8] sm:$0xff] }
  0x37   : > { %1225 = vmatprep.mubr.bf16.mxu1 %v473_v1  ;;  %v2627_v1 = vld [vmem:[%s3318_s1 + $0x148] sm:$0xff]   ;;  %v500_v7 = vpack.c.bf16 %v325_v0, %v318_v63  ;;  %v386_v59 = vld [vmem:[%s2780_s10 + $0x4d0] sm:$0xff]  ;;  %v388_v0 = vld [vmem:[%s2780_s10 + $0x4e0] sm:$0xff] }
  0x38   : > { %v393_v60 = vld [vmem:[%s2780_s10 + $0x508] sm:$0xff]  ;;  %v444_v48 = vld [vmem:[%s2780_s10 + $0x6a0] sm:$0xff] }
  0x39   : > { %2345 = vmatpush3.bf16.msra.mxu0 %v2621_v27  ;;  %v512_v27 = vpack.c.bf16 %v351_v24, %v344_v23  ;;  %v533_v63 = vpack.c.bf16 %v393_v60, %v386_v59  ;;  %v416_v24 = vld [vmem:[%s2780_s10 + $0x5c0] sm:$0xff] }
  0x3a   : > { %2346 = vmatprep.subr.bf16.mxu0 %v2622_v35  ;;  %v358_v35 = vld [vmem:[%s2780_s10 + $0x3f0] sm:$0xff]  ;;  %v252_v60 = vld [vmem:[%s2780_s10 + $0xa0] sm:$0xff] }
  0x3c   : > { %1065 = vmatmul.mubr.bf16.gmra.mxu0 %v470_v8  ;;  %v330_v8 = vld [vmem:[%s2780_s10 + $0x310] sm:$0xff] }
  0x3d   : > { %1072 = vmatprep.mubr.bf16.mxu0 %v478_v10  ;;  %2347 = vmatpush3.bf16.msra.mxu0 %v2623_v41  ;;  %v337_v10 = vld [vmem:[%s2780_s10 + $0x348] sm:$0xff]  ;;  %v367_v41 = vld [vmem:[%s2780_s10 + $0x438] sm:$0xff] }
  0x3e   : > { %1226 = vmatmul.mubr.bf16.gmra.mxu1 %v472_v14  ;;  %2348 = vmatprep.subr.bf16.mxu0 %v2625_v50  ;;  %v505_v14 = vpack.c.bf16 %v337_v10, %v330_v8  ;;  %v521_v45 = vpack.c.bf16 %v367_v41, %v360_v40  ;;  %v394_v50 = vld [vmem:[%s2780_s10 + $0x510] sm:$0xff]  ;;  %v407_v8 = vld [vmem:[%s2780_s10 + $0x578] sm:$0xff]  ;;  %v452_v40 = vld [vmem:[%s2780_s10 + $0x6e0] sm:$0xff] }
  0x3f   : > { %1233 = vmatprep.mubr.bf16.mxu1 %v480_v15  ;;  %v332_v15 = vld [vmem:[%s2780_s10 + $0x320] sm:$0xff]  ;;  %v422_v10 = vld [vmem:[%s2780_s10 + $0x5f0] sm:$0xff] }
  0x40   : > { %v507_v21 = vpack.c.bf16 %v339_v16, %v332_v15  ;;  %v417_v15 = vld [vmem:[%s2780_s10 + $0x5c8] sm:$0xff]  ;;  %v424_v16 = vld [vmem:[%s2780_s10 + $0x600] sm:$0xff] }
  0x41   : > { %2349 = vmatpush3.bf16.msra.mxu0 %v2626_v56  ;;  %v396_v56 = vld [vmem:[%s2780_s10 + $0x520] sm:$0xff] }
  0x42   : > { %2350 = vmatprep.subr.bf16.mxu0 %v2627_v1  ;;  %v395_v1 = vld [vmem:[%s2780_s10 + $0x518] sm:$0xff] }
  0x43   : > { %v535_v5 = vpack.c.bf16 %v395_v1, %v388_v0  ;;  %v273_v0 = vld [vmem:[%s2780_s10 + $0x148] sm:$0xff] }
  0x44   : > { %1073 = vmatmul.mubr.bf16.gmra.mxu0 %v477_v22  ;;  %v515_v22 = vpack.c.bf16 %v354_v20, %v347_v19  ;;  %v414_v19 = vld [vmem:[%s2780_s10 + $0x5b0] sm:$0xff]  ;;  %v421_v20 = vld [vmem:[%s2780_s10 + $0x5e8] sm:$0xff] }
  0x45   : > { %1080 = vmatprep.mubr.bf16.mxu0 %v485_v26  ;;  %2351 = vmatpush3.bf16.msra.mxu0 %v2628_v3  ;;  %v366_v26 = vld [vmem:[%s2780_s10 + $0x430] sm:$0xff]  ;;  %v403_v3 = vld [vmem:[%s2780_s10 + $0x558] sm:$0xff]  ;;  %v547_v23 = vpack.c.bf16 %v421_v20, %v414_v19  ;;  %v308_v20 = vld [vmem:[%s2780_s10 + $0x260] sm:$0xff] }
  0x46   : > { %1234 = vmatmul.mubr.bf16.gmra.mxu1 %v479_v28  ;;  %2352 = vmatprep.subr.bf16.mxu0 %v2629_v13  ;;  %v346_v28 = vld [vmem:[%s2780_s10 + $0x390] sm:$0xff]  ;;  %v520_v30 = vpack.c.bf16 %v366_v26, %v359_v25  ;;  %v409_v13 = vld [vmem:[%s2780_s10 + $0x588] sm:$0xff]  ;;  %v423_v25 = vld [vmem:[%s2780_s10 + $0x5f8] sm:$0xff] }
  0x47   : > { %1241 = vmatprep.mubr.bf16.mxu1 %v487_v29  ;;  %v353_v29 = vld [vmem:[%s2780_s10 + $0x3c8] sm:$0xff] }
  0x48   : > { %v514_v33 = vpack.c.bf16 %v353_v29, %v346_v28  ;;  %v438_v28 = vld [vmem:[%s2780_s10 + $0x670] sm:$0xff]  ;;  %v549_v29 = vpack.c.bf16 %v423_v25, %v416_v24  ;;  %v329_v24 = vld [vmem:[%s2780_s10 + $0x308] sm:$0xff] }
  0x49   : > { %2353 = vmatpush3.bf16.msra.mxu0 %v2630_v17  ;;  %v542_v17 = vpack.c.bf16 %v409_v13, %v402_v12  ;;  %v301_v12 = vld [vmem:[%s2780_s10 + $0x228] sm:$0xff] }
  0x4c   : > { %1081 = vmatmul.mubr.bf16.gmra.mxu0 %v484_v36  ;;  %v365_v36 = vld [vmem:[%s2780_s10 + $0x428] sm:$0xff] }
  0x4d   : > { %1088 = vmatprep.mubr.bf16.mxu0 %v492_v38  ;;  %v380_v38 = vld [vmem:[%s2780_s10 + $0x4a0] sm:$0xff]  ;;  %v519_v39 = vpack.c.bf16 %v365_v36, %v358_v35  ;;  %v554_v35 = vpack.c.bf16 %v435_v32, %v428_v31  ;;  %v430_v36 = vld [vmem:[%s2780_s10 + $0x630] sm:$0xff] }
  0x4e   : > { %1242 = vmatmul.mubr.bf16.gmra.mxu1 %v486_v43  ;;  %v527_v42 = vpack.c.bf16 %v380_v38, %v373_v37  ;;  %v375_v43 = vld [vmem:[%s2780_s10 + $0x478] sm:$0xff]  ;;  %v437_v37 = vld [vmem:[%s2780_s10 + $0x668] sm:$0xff]  ;;  %v336_v32 = vld [vmem:[%s2780_s10 + $0x340] sm:$0xff] }
  0x4f   : > { %1249 = vmatprep.mubr.bf16.mxu1 %v494_v44  ;;  %v382_v44 = vld [vmem:[%s2780_s10 + $0x4b0] sm:$0xff]  ;;  %v556_v41 = vpack.c.bf16 %v437_v37, %v430_v36  ;;  %v357_v36 = vld [vmem:[%s2780_s10 + $0x3e8] sm:$0xff] }
  0x50   : > { %v529_v46 = vpack.c.bf16 %v382_v44, %v375_v43  ;;  %v442_v43 = vld [vmem:[%s2780_s10 + $0x690] sm:$0xff]  ;;  %v449_v44 = vld [vmem:[%s2780_s10 + $0x6c8] sm:$0xff] }
  0x51   : > { %v561_v47 = vpack.c.bf16 %v449_v44, %v442_v43  ;;  %v364_v44 = vld [vmem:[%s2780_s10 + $0x420] sm:$0xff] }
  0x54   : > { %1089 = vmatmul.mubr.bf16.gmra.mxu0 %v491_v51  ;;  %v374_v51 = vld [vmem:[%s2780_s10 + $0x470] sm:$0xff] }
  0x55   : > { %1096 = vmatprep.mubr.bf16.mxu0 %v499_v54  ;;  %v534_v54 = vpack.c.bf16 %v394_v50, %v387_v49  ;;  %v451_v49 = vld [vmem:[%s2780_s10 + $0x6d8] sm:$0xff] }
  0x56   : > { %1250 = vmatmul.mubr.bf16.gmra.mxu1 %v493_v57  ;;  %v528_v57 = vpack.c.bf16 %v381_v52, %v374_v51  ;;  %v238_v51 = vld [vmem:[%s2780_s10 + $0x30] sm:$0xff]  ;;  %v245_v52 = vld [vmem:[%s2780_s10 + $0x68] sm:$0xff] }
  0x57   : > { %1257 = vmatprep.mubr.bf16.mxu1 %v501_v58  ;;  %v536_v58 = vpack.c.bf16 %v396_v56, %v389_v55  ;;  %v236_v55 = vld [vmem:[%s2780_s10 + $0x20] sm:$0xff]  ;;  %v243_v56 = vld [vmem:[%s2780_s10 + $0x58] sm:$0xff] }
  0x58   : > { %v460_v59 = vpack.c.bf16 %v243_v56, %v236_v55  ;;  %v392_v56 = vld [vmem:[%s2780_s10 + $0x500] sm:$0xff] }
  0x5c   : > { %1097 = vmatmul.mubr.bf16.gmra.mxu0 %v498_v2  ;;  %v541_v2 = vpack.c.bf16 %v408_v62, %v401_v61  ;;  %v259_v61 = vld [vmem:[%s2780_s10 + $0xd8] sm:$0xff] }
  0x5d   : > { %1104 = vmatprep.mubr.bf16.mxu0 %v506_v4  ;;  %v410_v4 = vld [vmem:[%s2780_s10 + $0x590] sm:$0xff]  ;;  %v469_v1 = vpack.c.bf16 %v259_v61, %v252_v60  ;;  %v413_v60 = vld [vmem:[%s2780_s10 + $0x5a8] sm:$0xff] }
  0x5e   : > { %1258 = vmatmul.mubr.bf16.gmra.mxu1 %v500_v7  ;;  %v543_v6 = vpack.c.bf16 %v410_v4, %v403_v3  ;;  %v400_v7 = vld [vmem:[%s2780_s10 + $0x540] sm:$0xff]  ;;  %v250_v3 = vld [vmem:[%s2780_s10 + $0x90] sm:$0xff]  ;;  %v257_v4 = vld [vmem:[%s2780_s10 + $0xc8] sm:$0xff] }
  0x5f   : > { %1265 = vmatprep.mubr.bf16.mxu1 %v508_v9  ;;  %v415_v9 = vld [vmem:[%s2780_s10 + $0x5b8] sm:$0xff]  ;;  %v540_v11 = vpack.c.bf16 %v407_v8, %v400_v7  ;;  %v467_v7 = vpack.c.bf16 %v257_v4, %v250_v3  ;;  %v280_v8 = vld [vmem:[%s2780_s10 + $0x180] sm:$0xff] }
  0x60   : > { %v420_v4 = vld [vmem:[%s2780_s10 + $0x5e0] sm:$0xff] }
  0x64   : > { %1105 = vmatmul.mubr.bf16.gmra.mxu0 %v505_v14  ;;  %v548_v14 = vpack.c.bf16 %v422_v10, %v415_v9  ;;  %v287_v9 = vld [vmem:[%s2780_s10 + $0x1b8] sm:$0xff] }
  0x65   : > { %1112 = vmatprep.mubr.bf16.mxu0 %v513_v18  ;;  %v550_v18 = vpack.c.bf16 %v424_v16, %v417_v15  ;;  %v483_v13 = vpack.c.bf16 %v287_v9, %v280_v8  ;;  %v264_v15 = vld [vmem:[%s2780_s10 + $0x100] sm:$0xff]  ;;  %v271_v16 = vld [vmem:[%s2780_s10 + $0x138] sm:$0xff]  ;;  %v441_v8 = vld [vmem:[%s2780_s10 + $0x688] sm:$0xff] }
  0x66   : > { %1266 = vmatmul.mubr.bf16.gmra.mxu1 %v507_v21  ;;  %v429_v21 = vld [vmem:[%s2780_s10 + $0x628] sm:$0xff]  ;;  %v474_v19 = vpack.c.bf16 %v271_v16, %v264_v15  ;;  %v448_v16 = vld [vmem:[%s2780_s10 + $0x6c0] sm:$0xff] }
  0x67   : > { %1273 = vmatprep.mubr.bf16.mxu1 %v515_v22  ;;  %v436_v22 = vld [vmem:[%s2780_s10 + $0x660] sm:$0xff] }
  0x68   : > { %v555_v26 = vpack.c.bf16 %v436_v22, %v429_v21  ;;  %v315_v21 = vld [vmem:[%s2780_s10 + $0x298] sm:$0xff] }
  0x69   : > { %v497_v25 = vpack.c.bf16 %v315_v21, %v308_v20  ;;  %v2631_v20 = vld [vmem:[%s3320_s3 + $0x38] sm:$0xff]   ;;  %v348_v21 = vld [vmem:[%s2780_s10 + $0x3a0] sm:$0xff] }
  0x6a   : > { %2525 = vmatprep.subr.bf16.mxu1 %v2631_v20 }
  0x6c   : > { %1113 = vmatmul.mubr.bf16.gmra.mxu0 %v512_v27  ;;  %v431_v27 = vld [vmem:[%s2780_s10 + $0x638] sm:$0xff] }
  0x6d   : > { %1120 = vmatprep.mubr.bf16.mxu0 %v520_v30  ;;  %v557_v30 = vpack.c.bf16 %v438_v28, %v431_v27  ;;  %v278_v27 = vld [vmem:[%s2780_s10 + $0x170] sm:$0xff]  ;;  %v285_v28 = vld [vmem:[%s2780_s10 + $0x1a8] sm:$0xff] }
  0x6e   : > { %1274 = vmatmul.mubr.bf16.gmra.mxu1 %v514_v33  ;;  %v443_v33 = vld [vmem:[%s2780_s10 + $0x698] sm:$0xff]  ;;  %v481_v31 = vpack.c.bf16 %v285_v28, %v278_v27 }
  0x6f   : > { %1281 = vmatprep.mubr.bf16.mxu1 %v522_v34  ;;  %v450_v34 = vld [vmem:[%s2780_s10 + $0x6d0] sm:$0xff] }
  0x70   : > { %v562_v38 = vpack.c.bf16 %v450_v34, %v443_v33  ;;  %v343_v33 = vld [vmem:[%s2780_s10 + $0x378] sm:$0xff] }
  0x71   : > { %v511_v37 = vpack.c.bf16 %v343_v33, %v336_v32  ;;  %v3070_v32 = vld [vmem:[%s3319_s2] ss:$0 sm:$0xff] }
  0x74   : > { %1121 = vmatmul.mubr.bf16.gmra.mxu0 %v519_v39  ;;  %v445_v39 = vld [vmem:[%s2780_s10 + $0x6a8] sm:$0xff] }
  0x75   : > { %1128 = vmatprep.mubr.bf16.mxu0 %v527_v42  ;;  %v564_v42 = vpack.c.bf16 %v452_v40, %v445_v39  ;;  %v292_v39 = vld [vmem:[%s2780_s10 + $0x1e0] sm:$0xff]  ;;  %v299_v40 = vld [vmem:[%s2780_s10 + $0x218] sm:$0xff] }
  0x76   : > { %1282 = vmatmul.mubr.bf16.gmra.mxu1 %v521_v45  ;;  %v237_v45 = vld [vmem:[%s2780_s10 + $0x28] sm:$0xff]  ;;  %v488_v43 = vpack.c.bf16 %v299_v40, %v292_v39  ;;  %v2634_v40 = vld [vmem:[%s3320_s3 + $0x20] sm:$0xff]  }
  0x77   : > { %1289 = vmatprep.mubr.bf16.mxu1 %v529_v46  ;;  %v244_v46 = vld [vmem:[%s2780_s10 + $0x60] sm:$0xff] }
  0x78   : > { %v461_v50 = vpack.c.bf16 %v244_v46, %v237_v45  ;;  %v371_v45 = vld [vmem:[%s2780_s10 + $0x458] sm:$0xff] }
  0x7c   : > { %1129 = vmatmul.mubr.bf16.gmra.mxu0 %v526_v53  ;;  %v563_v53 = vpack.c.bf16 %v451_v49, %v444_v48  ;;  %v385_v48 = vld [vmem:[%s2780_s10 + $0x4c8] sm:$0xff]  ;;  %v525_v49 = vpack.c.bf16 %v371_v45, %v364_v44 }
  0x7d   : > { %1136 = vmatprep.mubr.bf16.mxu0 %v534_v54  ;;  %v462_v54 = vpack.c.bf16 %v245_v52, %v238_v51  ;;  %v306_v51 = vld [vmem:[%s2780_s10 + $0x250] sm:$0xff]  ;;  %v313_v52 = vld [vmem:[%s2780_s10 + $0x288] sm:$0xff] }
  0x7e   : > { %1290 = vmatmul.mubr.bf16.gmra.mxu1 %v528_v57  ;;  %v251_v57 = vld [vmem:[%s2780_s10 + $0x98] sm:$0xff]  ;;  %v495_v55 = vpack.c.bf16 %v313_v52, %v306_v51 }
  0x7f   : > { %1297 = vmatprep.mubr.bf16.mxu1 %v536_v58  ;;  %v258_v58 = vld [vmem:[%s2780_s10 + $0xd0] sm:$0xff] }
  0x80   : > { %v468_v62 = vpack.c.bf16 %v258_v58, %v251_v57  ;;  %v399_v57 = vld [vmem:[%s2780_s10 + $0x538] sm:$0xff] }
  0x81   : > { %v539_v61 = vpack.c.bf16 %v399_v57, %v392_v56  ;;  %v391_v57 = vld [vmem:[%s2780_s10 + $0x4f8] sm:$0xff] }
  0x84   : > { %1137 = vmatmul.mubr.bf16.gmra.mxu0 %v533_v63  ;;  %v266_v63 = vld [vmem:[%s2780_s10 + $0x110] sm:$0xff] }
  0x85   : > { %1144 = vmatprep.mubr.bf16.mxu0 %v541_v2  ;;  %v476_v2 = vpack.c.bf16 %v273_v0, %v266_v63  ;;  %v320_v63 = vld [vmem:[%s2780_s10 + $0x2c0] sm:$0xff]  ;;  %v327_v0 = vld [vmem:[%s2780_s10 + $0x2f8] sm:$0xff] }
  0x86   : > { %1298 = vmatmul.mubr.bf16.gmra.mxu1 %v535_v5  ;;  %v265_v5 = vld [vmem:[%s2780_s10 + $0x108] sm:$0xff]  ;;  %v502_v3 = vpack.c.bf16 %v327_v0, %v320_v63  ;;  %v2636_v0 = vld [vmem:[%s3320_s3 + $0x10] sm:$0xff]  }
  0x87   : > { %1305 = vmatprep.mubr.bf16.mxu1 %v543_v6  ;;  %v272_v6 = vld [vmem:[%s2780_s10 + $0x140] sm:$0xff] }
  0x88   : > { %v475_v10 = vpack.c.bf16 %v272_v6, %v265_v5  ;;  %v427_v5 = vld [vmem:[%s2780_s10 + $0x618] sm:$0xff] }
  0x89   : > { %v553_v9 = vpack.c.bf16 %v427_v5, %v420_v4 }
  0x8c   : > { %1145 = vmatmul.mubr.bf16.gmra.mxu0 %v540_v11  ;;  %v294_v11 = vld [vmem:[%s2780_s10 + $0x1f0] sm:$0xff] }
  0x8d   : > { %1152 = vmatprep.mubr.bf16.mxu0 %v548_v14  ;;  %v490_v14 = vpack.c.bf16 %v301_v12, %v294_v11  ;;  %v334_v11 = vld [vmem:[%s2780_s10 + $0x330] sm:$0xff]  ;;  %v341_v12 = vld [vmem:[%s2780_s10 + $0x368] sm:$0xff] }
  0x8e   : > { %1306 = vmatmul.mubr.bf16.gmra.mxu1 %v542_v17  ;;  %v279_v17 = vld [vmem:[%s2780_s10 + $0x178] sm:$0xff]  ;;  %v509_v15 = vpack.c.bf16 %v341_v12, %v334_v11 }
  0x8f   : > { %1313 = vmatprep.mubr.bf16.mxu1 %v550_v18  ;;  %v286_v18 = vld [vmem:[%s2780_s10 + $0x1b0] sm:$0xff] }
  0x90   : > { %v482_v22 = vpack.c.bf16 %v286_v18, %v279_v17  ;;  %v455_v17 = vld [vmem:[%s2780_s10 + $0x6f8] sm:$0xff] }
  0x94   : > { %1153 = vmatmul.mubr.bf16.gmra.mxu0 %v547_v23  ;;  %v322_v23 = vld [vmem:[%s2780_s10 + $0x2d0] sm:$0xff] }
  0x95   : > { %1160 = vmatprep.mubr.bf16.mxu0 %v555_v26  ;;  %v504_v26 = vpack.c.bf16 %v329_v24, %v322_v23  ;;  %v363_v23 = vld [vmem:[%s2780_s10 + $0x418] sm:$0xff]  ;;  %v370_v24 = vld [vmem:[%s2780_s10 + $0x450] sm:$0xff] }
  0x96   : > { %1314 = vmatmul.mubr.bf16.gmra.mxu1 %v549_v29  ;;  %v293_v29 = vld [vmem:[%s2780_s10 + $0x1e8] sm:$0xff]  ;;  %v524_v27 = vpack.c.bf16 %v370_v24, %v363_v23  ;;  %v2638_v24 = vld [vmem:[%s3320_s3] sm:$0xff]  }
  0x97   : > { %1321 = vmatprep.mubr.bf16.mxu1 %v557_v30  ;;  %v300_v30 = vld [vmem:[%s2780_s10 + $0x220] sm:$0xff] }
  0x98   : > { %v489_v34 = vpack.c.bf16 %v300_v30, %v293_v29  ;;  %v2633_v29 = vld [vmem:[%s3320_s3 + $0x28] sm:$0xff]   ;;  %v362_v30 = vld [vmem:[%s2780_s10 + $0x410] sm:$0xff] }
  0x9c   : > { %1161 = vmatmul.mubr.bf16.gmra.mxu0 %v554_v35  ;;  %v350_v35 = vld [vmem:[%s2780_s10 + $0x3b0] sm:$0xff] }
  0x9d   : > { %1168 = vmatprep.mubr.bf16.mxu0 %v562_v38  ;;  %v518_v38 = vpack.c.bf16 %v357_v36, %v350_v35  ;;  %v384_v35 = vld [vmem:[%s2780_s10 + $0x4c0] sm:$0xff] }
  0x9e   : > { %1322 = vmatmul.mubr.bf16.gmra.mxu1 %v556_v41  ;;  %v307_v41 = vld [vmem:[%s2780_s10 + $0x258] sm:$0xff] }
  0x9f   : > { %1329 = vmatprep.mubr.bf16.mxu1 %v564_v42  ;;  %v314_v42 = vld [vmem:[%s2780_s10 + $0x290] sm:$0xff] }
  0xa0   : > { %v496_v46 = vpack.c.bf16 %v314_v42, %v307_v41 }
  0xa4   : > { %1169 = vmatmul.mubr.bf16.gmra.mxu0 %v561_v47  ;;  %v378_v47 = vld [vmem:[%s2780_s10 + $0x490] sm:$0xff] }
  0xa5   : > { %1370 = vmatprep.mubr.bf16.mxu0 %v461_v50  ;;  %v532_v50 = vpack.c.bf16 %v385_v48, %v378_v47 }
  0xa6   : > { %1330 = vmatmul.mubr.bf16.gmra.mxu1 %v563_v53  ;;  %v321_v53 = vld [vmem:[%s2780_s10 + $0x2c8] sm:$0xff] }
  0xa7   : > { %2493 = vmatprep.mubr.msk.bf16.mxu1 %vm967_vm0, %v462_v54  ;;  %v328_v54 = vld [vmem:[%s2780_s10 + $0x300] sm:$0xff] }
  0xa8   : > { %v503_v58 = vpack.c.bf16 %v328_v54, %v321_v53  ;;  %v376_v53 = vld [vmem:[%s2780_s10 + $0x480] sm:$0xff]  ;;  %v383_v54 = vld [vmem:[%s2780_s10 + $0x4b8] sm:$0xff] }
  0xa9   : > { %v530_v63 = vpack.c.bf16 %v383_v54, %v376_v53 }
  0xac   : > { %1371 = vmatmul.mubr.bf16.vlgmr.msra.gmra.mxu0 %v460_v59  ;;  %v406_v59 = vld [vmem:[%s2780_s10 + $0x570] sm:$0xff] }
  0xad   : > { %1378 = vmatprep.mubr.bf16.mxu0 %v468_v62  ;;  %v546_v62 = vpack.c.bf16 %v413_v60, %v406_v59 }
  0xae   : > { %2494 = vmatmul.mubr.msk.bf16.vlgmr.msra.gmra.mxu1 %vm967_vm0, %v469_v1  ;;  %v335_v1 = vld [vmem:[%s2780_s10 + $0x338] sm:$0xff] }
  0xaf   : > { %2497 = vmatprep.mubr.msk.bf16.mxu1 %vm967_vm0, %v476_v2  ;;  %v342_v2 = vld [vmem:[%s2780_s10 + $0x370] sm:$0xff]  ;;  %2526 = vmatpush3.bf16.msra.mxu1 %v2631_v20 }
  0xb0   : > { %v510_v6 = vpack.c.bf16 %v342_v2, %v335_v1 }
  0xb4   : > { %1379 = vmatmul.mubr.bf16.gmra.mxu0 %v467_v7  ;;  %v434_v7 = vld [vmem:[%s2780_s10 + $0x650] sm:$0xff] }
  0xb5   : > { %1386 = vmatprep.mubr.bf16.mxu0 %v475_v10  ;;  %v560_v10 = vpack.c.bf16 %v441_v8, %v434_v7 }
  0xb6   : > { %2498 = vmatmul.mubr.msk.bf16.gmra.mxu1 %vm967_vm0, %v483_v13  ;;  %v349_v13 = vld [vmem:[%s2780_s10 + $0x3a8] sm:$0xff] }
  0xb7   : > { %2501 = vmatprep.mubr.msk.bf16.mxu1 %vm967_vm0, %v490_v14  ;;  %v356_v14 = vld [vmem:[%s2780_s10 + $0x3e0] sm:$0xff] }
  0xb8   : > { %v517_v18 = vpack.c.bf16 %v356_v14, %v349_v13  ;;  %v390_v13 = vld [vmem:[%s2780_s10 + $0x4f0] sm:$0xff]  ;;  %v397_v14 = vld [vmem:[%s2780_s10 + $0x528] sm:$0xff] }
  0xb9   : > { %v537_v23 = vpack.c.bf16 %v397_v14, %v390_v13 }
  0xbc   : > { %1387 = vmatmul.mubr.bf16.gmra.mxu0 %v474_v19  ;;  %v567_v19 = vpack.c.bf16 %v455_v17, %v448_v16  ;;  %v405_v17 = vld [vmem:[%s2780_s10 + $0x568] sm:$0xff] }
  0xbd   : > { %1394 = vmatprep.mubr.bf16.mxu0 %v482_v22  ;;  %v355_v22 = vld [vmem:[%s2780_s10 + $0x3d8] sm:$0xff] }
  0xbe   : > { %2502 = vmatmul.mubr.msk.bf16.gmra.mxu1 %vm967_vm0, %v497_v25  ;;  %v516_v25 = vpack.c.bf16 %v355_v22, %v348_v21 }
  0xbf   : > { %2505 = vmatprep.mubr.msk.bf16.mxu1 %vm967_vm0, %v504_v26  ;;  %v2632_v26 = vld [vmem:[%s3320_s3 + $0x30] sm:$0xff]  }
  0xc0   : > { %2527 = vmatprep.subr.bf16.mxu1 %v2632_v26 }
  0xc1   : > { %2528 = vmatpush3.bf16.msra.mxu1 %v2632_v26 }
  0xc2   : > { %2529 = vmatprep.subr.bf16.mxu1 %v2633_v29 }
  0xc4   : > { %1395 = vmatmul.mubr.bf16.gmra.mxu0 %v481_v31  ;;  %v369_v31 = vld [vmem:[%s2780_s10 + $0x448] sm:$0xff] }
  0xc5   : > { %1402 = vmatprep.mubr.bf16.mxu0 %v489_v34  ;;  %v377_v34 = vld [vmem:[%s2780_s10 + $0x488] sm:$0xff]  ;;  %v523_v39 = vpack.c.bf16 %v369_v31, %v362_v30  ;;  %2530 = vmatpush3.bf16.msra.mxu1 %v2633_v29 }
  0xc6   : > { %2506 = vmatmul.mubr.msk.bf16.gmra.mxu1 %vm967_vm0, %v511_v37  ;;  %2531 = vmatprep.subr.bf16.mxu1 %v2634_v40 }
  0xc7   : > { %2509 = vmatprep.mubr.msk.bf16.mxu1 %vm967_vm0, %v518_v38 }
  0xc9   : > { %2532 = vmatpush3.bf16.msra.mxu1 %v2634_v40 }
  0xcc   : > { %1403 = vmatmul.mubr.bf16.gmra.mxu0 %v488_v43  ;;  %v531_v43 = vpack.c.bf16 %v384_v35, %v377_v34 }
  0xcd   : > { %1410 = vmatprep.mubr.bf16.mxu0 %v496_v46 }
  0xce   : > { %2510 = vmatmul.mubr.msk.bf16.gmra.mxu1 %vm967_vm0, %v525_v49 }
  0xcf   : > { %2513 = vmatprep.mubr.msk.bf16.mxu1 %vm967_vm0, %v532_v50  ;;  %v2635_v50 = vld [vmem:[%s3320_s3 + $0x18] sm:$0xff]  }
  0xd0   : > { %2533 = vmatprep.subr.bf16.mxu1 %v2635_v50 }
  0xd1   : > { %2534 = vmatpush3.bf16.msra.mxu1 %v2635_v50 }
  0xd2   : > { %2535 = vmatprep.subr.bf16.mxu1 %v2636_v0 }
  0xd4   : > { %1411 = vmatmul.mubr.bf16.gmra.mxu0 %v495_v55 }
  0xd5   : > { %1418 = vmatprep.mubr.bf16.mxu0 %v503_v58  ;;  %v398_v58 = vld [vmem:[%s2780_s10 + $0x530] sm:$0xff]  ;;  %2536 = vmatpush3.bf16.msra.mxu1 %v2636_v0 }
  0xd6   : > { %2514 = vmatmul.mubr.msk.bf16.gmra.mxu1 %vm967_vm0, %v539_v61 }
  0xd7   : > { %2517 = vmatprep.mubr.msk.bf16.mxu1 %vm967_vm0, %v546_v62 }
  0xdc   : > { %1419 = vmatmul.mubr.bf16.gmra.mxu0 %v502_v3  ;;  %v538_v3 = vpack.c.bf16 %v398_v58, %v391_v57 }
  0xdd   : > { %1426 = vmatprep.mubr.bf16.mxu0 %v510_v6 }
  0xde   : > { %2518 = vmatmul.mubr.msk.bf16.gmra.mxu1 %vm967_vm0, %v553_v9 }
  0xdf   : > { %2521 = vmatprep.mubr.msk.bf16.mxu1 %vm967_vm0, %v560_v10  ;;  %v2637_v10 = vld [vmem:[%s3320_s3 + $0x8] sm:$0xff]  }
  0xe0   : > { %2537 = vmatprep.subr.bf16.mxu1 %v2637_v10 }
  0xe1   : > { %2538 = vmatpush3.bf16.msra.mxu1 %v2637_v10 }
  0xe2   : > { %2539 = vmatprep.subr.bf16.mxu1 %v2638_v24 }
  0xe4   : > { %1427 = vmatmul.mubr.bf16.gmra.mxu0 %v509_v15 }
  0xe5   : > { %1434 = vmatprep.mubr.bf16.mxu0 %v517_v18  ;;  %v412_v18 = vld [vmem:[%s2780_s10 + $0x5a0] sm:$0xff]  ;;  %2540 = vmatpush3.bf16.msra.mxu1 %v2638_v24 }
  0xe6   : > { %2522 = vmatmul.mubr.msk.bf16.gmra.mxu1 %vm967_vm0, %v567_v19 }
  0xec   : > { %v2130_v28 = vpop.f32.mrf.mxu0  ;;  %1435 = vmatmul.mubr.bf16.gmra.mxu0 %v516_v25 }
  0xed   : > { %1442 = vmatprep.mubr.bf16.mxu0 %v524_v27  ;;  %v545_v27 = vpack.c.bf16 %v412_v18, %v405_v17 }
  0xee   : > { %v2131_v33 = vpop.f32.mrf.mxu0  ;;  %v2242_v37 = vpop.f32.mrf.mxu1 }
  0xef   : > { %v2132_v36 = vadd.f32 %v2131_v33, %v2130_v28 }
  0xf0   : > { %v2133_v38 = vpop.f32.mrf.mxu0  ;;  %v2243_v42 = vpop.f32.mrf.mxu1 }
  0xf1   : > { %v1051_v41 = vadd.f32 %v2132_v36, %v3070_v32  ;;  %v2244_v44 = vadd.f32 %v2243_v42, %v2242_v37  ;;  %v404_v37 = vld [vmem:[%s2780_s10 + $0x560] sm:$0xff]  ;;  %v426_v42 = vld [vmem:[%s2780_s10 + $0x610] sm:$0xff] }
  0xf2   : > { %v2134_v45 = vpop.f32.mrf.mxu0  ;;  %v2245_v47 = vpop.f32.mrf.mxu1 }
  0xf3   : > { %v2135_v46 = vadd.f32 %v2134_v45, %v2133_v38  ;;  %v3078_v48 = vadd.f32 %v2244_v44, %v1051_v41  ;;  %v411_v38 = vld [vmem:[%s2780_s10 + $0x598] sm:$0xff] }
  0xf4   : > { %v2136_v49 = vpop.f32.mrf.mxu0  ;;  %1443 = vmatmul.mubr.bf16.gmra.mxu0 %v523_v39  ;;  %v2246_v52 = vpop.f32.mrf.mxu1  ;;  %v419_v41 = vld [vmem:[%s2780_s10 + $0x5d8] sm:$0xff] }
  0xf5   : > { %v1054_v51 = vadd.f32 %v2135_v46, %v3070_v32  ;;  %1450 = vmatprep.mubr.bf16.mxu0 %v531_v43  ;;  %v2247_v55 = vadd.f32 %v2246_v52, %v2245_v47  ;;  %v544_v47 = vpack.c.bf16 %v411_v38, %v404_v37 }
  0xf6   : > { %v2137_v56 = vpop.f32.mrf.mxu0  ;;  %v2248_v60 = vpop.f32.mrf.mxu1 }
  0xf7   : > { %v2138_v59 = vadd.f32 %v2137_v56, %v2136_v49  ;;  %v3088_v61 = vadd.f32 %v2247_v55, %v1054_v51  ;;  %v552_v51 = vpack.c.bf16 %v426_v42, %v419_v41 }
  0xf8   : > { %v2139_v62 = vpop.f32.mrf.mxu0  ;;  %v2249_v2 = vpop.f32.mrf.mxu1 }
  0xf9   : > { %v1059_v1 = vadd.f32 %v2138_v59, %v3070_v32  ;;  %v2250_v4 = vadd.f32 %v2249_v2, %v2248_v60  ;;  %v418_v60 = vld [vmem:[%s2780_s10 + $0x5d0] sm:$0xff]  ;;  %v440_v2 = vld [vmem:[%s2780_s10 + $0x680] sm:$0xff] }
  0xfa   : > { %v2140_v5 = vpop.f32.mrf.mxu0  ;;  %v2251_v7 = vpop.f32.mrf.mxu1 }
  0xfb   : > { %v2141_v6 = vadd.f32 %v2140_v5, %v2139_v62  ;;  %v3094_v8 = vadd.f32 %v2250_v4, %v1059_v1  ;;  %v425_v62 = vld [vmem:[%s2780_s10 + $0x608] sm:$0xff] }
  0xfc   : > { %v2142_v9 = vpop.f32.mrf.mxu0  ;;  %1451 = vmatmul.mubr.bf16.gmra.mxu0 %v530_v63  ;;  %v2252_v12 = vpop.f32.mrf.mxu1  ;;  %v433_v1 = vld [vmem:[%s2780_s10 + $0x648] sm:$0xff] }
  0xfd   : > { %v1062_v11 = vadd.f32 %v2141_v6, %v3070_v32  ;;  %1458 = vmatprep.mubr.bf16.mxu0 %v538_v3  ;;  %v2253_v15 = vadd.f32 %v2252_v12, %v2251_v7  ;;  %v551_v7 = vpack.c.bf16 %v425_v62, %v418_v60 }
  0xfe   : > { %v2143_v16 = vpop.f32.mrf.mxu0  ;;  %v2254_v20 = vpop.f32.mrf.mxu1 }
  0xff   : > { %v2144_v19 = vadd.f32 %v2143_v16, %v2142_v9  ;;  %v3104_v21 = vadd.f32 %v2253_v15, %v1062_v11  ;;  %v559_v11 = vpack.c.bf16 %v440_v2, %v433_v1 }
 0x100   : > { %v2145_v22 = vpop.f32.mrf.mxu0  ;;  %v2255_v26 = vpop.f32.mrf.mxu1 }
 0x101   : > { %v1067_v25 = vadd.f32 %v2144_v19, %v3070_v32  ;;  %v2256_v28 = vadd.f32 %v2255_v26, %v2254_v20  ;;  %v432_v20 = vld [vmem:[%s2780_s10 + $0x640] sm:$0xff]  ;;  %v454_v26 = vld [vmem:[%s2780_s10 + $0x6f0] sm:$0xff] }
 0x102   : > { %v2146_v29 = vpop.f32.mrf.mxu0  ;;  %v2257_v31 = vpop.f32.mrf.mxu1 }
 0x103   : > { %v2147_v30 = vadd.f32 %v2146_v29, %v2145_v22  ;;  %v3110_v33 = vadd.f32 %v2256_v28, %v1067_v25  ;;  %v439_v22 = vld [vmem:[%s2780_s10 + $0x678] sm:$0xff] }
 0x104   : > { %v2148_v34 = vpop.f32.mrf.mxu0  ;;  %1459 = vmatmul.mubr.bf16.gmra.mxu0 %v537_v23  ;;  %v2258_v36 = vpop.f32.mrf.mxu1  ;;  %v447_v25 = vld [vmem:[%s2780_s10 + $0x6b8] sm:$0xff] }
 0x105   : > { %v1070_v35 = vadd.f32 %v2147_v30, %v3070_v32  ;;  %1466 = vmatprep.mubr.bf16.mxu0 %v545_v27  ;;  %v2259_v39 = vadd.f32 %v2258_v36, %v2257_v31  ;;  %v558_v31 = vpack.c.bf16 %v439_v22, %v432_v20  ;;  %v566_v36 = vpack.c.bf16 %v454_v26, %v447_v25 }
 0x106   : > { %v2149_v40 = vpop.f32.mrf.mxu0  ;;  %v2260_v44 = vpop.f32.mrf.mxu1 }
 0x107   : > { %v2150_v43 = vadd.f32 %v2149_v40, %v2148_v34  ;;  %v3117_v45 = vadd.f32 %v2259_v39, %v1070_v35 }
 0x108   : > { %v2151_v46 = vpop.f32.mrf.mxu0  ;;  %v2261_v50 = vpop.f32.mrf.mxu1 }
 0x109   : > { %v1075_v49 = vadd.f32 %v2150_v43, %v3070_v32  ;;  %v2262_v52 = vadd.f32 %v2261_v50, %v2260_v44 }
 0x10a   : > { %v2152_v53 = vpop.f32.mrf.mxu0  ;;  %v2263_v55 = vpop.f32.mrf.mxu1 }
 0x10b   : > { %v2153_v54 = vadd.f32 %v2152_v53, %v2151_v46  ;;  %v3120_v56 = vadd.f32 %v2262_v52, %v1075_v49  ;;  %v446_v46 = vld [vmem:[%s2780_s10 + $0x6b0] sm:$0xff] }
 0x10c   : > { %v2154_v57 = vpop.f32.mrf.mxu0  ;;  %1467 = vmatmul.mubr.bf16.gmra.mxu0 %v544_v47  ;;  %v2264_v59 = vpop.f32.mrf.mxu1  ;;  %v453_v47 = vld [vmem:[%s2780_s10 + $0x6e8] sm:$0xff]  ;;  %s2036_s10 = sshll.u32 %s3324_s25, 3 }
 0x10d   : > { %v1078_v58 = vadd.f32 %v2153_v54, %v3070_v32  ;;  %1474 = vmatprep.mubr.bf16.mxu0 %v552_v51  ;;  %v2265_v63 = vadd.f32 %v2264_v59, %v2263_v55  ;;  %v565_v55 = vpack.c.bf16 %v453_v47, %v446_v46  ;;  %s3248_s7 = scalar_lea.vmem %s3322_s5, %s2036_s10 }
 0x10e   : > { %v2155_v0 = vpop.f32.mrf.mxu0  ;;  %v2266_v4 = vpop.f32.mrf.mxu1 }
 0x10f   : > { %v2156_v3 = vadd.f32 %v2155_v0, %v2154_v57  ;;  %v3127_v5 = vadd.f32 %v2265_v63, %v1078_v58 }
 0x110   : > { %v2157_v6 = vpop.f32.mrf.mxu0  ;;  %v2267_v10 = vpop.f32.mrf.mxu1 }
 0x111   : > { %v1083_v9 = vadd.f32 %v2156_v3, %v3070_v32  ;;  %v2268_v12 = vadd.f32 %v2267_v10, %v2266_v4 }
 0x112   : > { %v2158_v13 = vpop.f32.mrf.mxu0  ;;  %v2269_v15 = vpop.f32.mrf.mxu1 }
 0x113   : > { %v2159_v14 = vadd.f32 %v2158_v13, %v2157_v6  ;;  %v3130_v16 = vadd.f32 %v2268_v12, %v1083_v9 }
 0x114   : > { %v2160_v17 = vpop.f32.mrf.mxu0  ;;  %1475 = vmatmul.mubr.bf16.gmra.mxu0 %v551_v7  ;;  %v2270_v19 = vpop.f32.mrf.mxu1 }
 0x115   : > { %v1086_v18 = vadd.f32 %v2159_v14, %v3070_v32  ;;  %1482 = vmatprep.mubr.bf16.mxu0 %v559_v11  ;;  %v2271_v23 = vadd.f32 %v2270_v19, %v2269_v15 }
 0x116   : > { %v2161_v24 = vpop.f32.mrf.mxu0  ;;  %v2272_v28 = vpop.f32.mrf.mxu1 }
 0x117   : > { %v2162_v27 = vadd.f32 %v2161_v24, %v2160_v17  ;;  %v3137_v29 = vadd.f32 %v2271_v23, %v1086_v18 }
 0x118   : > { %v2163_v30 = vpop.f32.mrf.mxu0  ;;  %v2273_v35 = vpop.f32.mrf.mxu1 }
 0x119   : > { %v1091_v34 = vadd.f32 %v2162_v27, %v3070_v32  ;;  %v2274_v37 = vadd.f32 %v2273_v35, %v2272_v28 }
 0x11a   : > { %v2164_v38 = vpop.f32.mrf.mxu0  ;;  %v2275_v40 = vpop.f32.mrf.mxu1 }
 0x11b   : > { %v2165_v39 = vadd.f32 %v2164_v38, %v2163_v30  ;;  %v3140_v41 = vadd.f32 %v2274_v37, %v1091_v34 }
 0x11c   : > { %v2166_v42 = vpop.f32.mrf.mxu0  ;;  %1483 = vmatmul.mubr.bf16.gmra.mxu0 %v558_v31  ;;  %v2276_v44 = vpop.f32.mrf.mxu1 }
 0x11d   : > { %v1094_v43 = vadd.f32 %v2165_v39, %v3070_v32  ;;  %1490 = vmatprep.mubr.bf16.mxu0 %v566_v36  ;;  %v2277_v49 = vadd.f32 %v2276_v44, %v2275_v40 }
 0x11e   : > { %v2167_v50 = vpop.f32.mrf.mxu0  ;;  %v2278_v52 = vpop.f32.mrf.mxu1 }
 0x11f   : > { %v2168_v51 = vadd.f32 %v2167_v50, %v2166_v42  ;;  %v3145_v53 = vadd.f32 %v2277_v49, %v1094_v43 }
 0x120   : > { %v2169_v54 = vpop.f32.mrf.mxu0  ;;  %v2279_v58 = vpop.f32.mrf.mxu1 }
 0x121   : > { %v1099_v57 = vadd.f32 %v2168_v51, %v3070_v32  ;;  %v2280_v59 = vadd.f32 %v2279_v58, %v2278_v52 }
 0x122   : > { %v2170_v60 = vpop.f32.mrf.mxu0  ;;  %v2281_v63 = vpop.f32.mrf.mxu1 }
 0x123   : > { %v2171_v62 = vadd.f32 %v2170_v60, %v2169_v54  ;;  %v3148_v0 = vadd.f32 %v2280_v59, %v1099_v57 }
 0x124   : > { %v2172_v1 = vpop.f32.mrf.mxu0  ;;  %1491 = vmatmul.mubr.bf16.gmra.mxu0 %v565_v55  ;;  %v2282_v3 = vpop.f32.mrf.mxu1 }
 0x125   : > { %v1102_v2 = vadd.f32 %v2171_v62, %v3070_v32  ;;  %v2283_v4 = vadd.f32 %v2282_v3, %v2281_v63 }
 0x126   : > { %v2173_v6 = vpop.f32.mrf.mxu0  ;;  %v2284_v9 = vpop.f32.mrf.mxu1 }
 0x127   : > { %v2174_v7 = vadd.f32 %v2173_v6, %v2172_v1  ;;  %v3151_v10 = vadd.f32 %v2283_v4, %v1102_v2 }
 0x128   : > { %v2175_v11 = vpop.f32.mrf.mxu0  ;;  %v2285_v13 = vpop.f32.mrf.mxu1 }
 0x129   : > { %v1107_v12 = vadd.f32 %v2174_v7, %v3070_v32  ;;  %v2286_v14 = vadd.f32 %v2285_v13, %v2284_v9 }
 0x12a   : > { %v2176_v15 = vpop.f32.mrf.mxu0  ;;  %v2287_v18 = vpop.f32.mrf.mxu1 }
 0x12b   : > { %v2177_v17 = vadd.f32 %v2176_v15, %v2175_v11  ;;  %v3154_v19 = vadd.f32 %v2286_v14, %v1107_v12 }
 0x12c   : > { %v2178_v20 = vpop.f32.mrf.mxu0  ;;  %v2288_v23 = vpop.f32.mrf.mxu1 }
 0x12d   : > { %v1110_v22 = vadd.f32 %v2177_v17, %v3070_v32  ;;  %v2289_v24 = vadd.f32 %v2288_v23, %v2287_v18 }
 0x12e   : > { %v2179_v25 = vpop.f32.mrf.mxu0  ;;  %v2290_v27 = vpop.f32.mrf.mxu1 }
 0x12f   : > { %v2180_v26 = vadd.f32 %v2179_v25, %v2178_v20  ;;  %v3157_v28 = vadd.f32 %v2289_v24, %v1110_v22 }
 0x130   : > { %v2181_v30 = vpop.f32.mrf.mxu0  ;;  %v2291_v34 = vpop.f32.mrf.mxu1 }
 0x131   : > { %v1115_v31 = vadd.f32 %v2180_v26, %v3070_v32  ;;  %v2292_v35 = vadd.f32 %v2291_v34, %v2290_v27 }
 0x132   : > { %v2182_v36 = vpop.f32.mrf.mxu0  ;;  %v2293_v38 = vpop.f32.mrf.mxu1 }
 0x133   : > { %v2183_v37 = vadd.f32 %v2182_v36, %v2181_v30  ;;  %v3160_v39 = vadd.f32 %v2292_v35, %v1115_v31 }
 0x134   : > { %v2184_v40 = vpop.f32.mrf.mxu0  ;;  %v2294_v43 = vpop.f32.mrf.mxu1 }
 0x135   : > { %v1118_v42 = vadd.f32 %v2183_v37, %v3070_v32  ;;  %v2295_v44 = vadd.f32 %v2294_v43, %v2293_v38 }
 0x136   : > { %v2185_v46 = vpop.f32.mrf.mxu0  ;;  %v2296_v49 = vpop.f32.mrf.mxu1 }
 0x137   : > { %v2186_v47 = vadd.f32 %v2185_v46, %v2184_v40  ;;  %v3163_v50 = vadd.f32 %v2295_v44, %v1118_v42 }
 0x138   : > { %v2187_v51 = vpop.f32.mrf.mxu0  ;;  %v2297_v54 = vpop.f32.mrf.mxu1 }
 0x139   : > { %v1123_v52 = vadd.f32 %v2186_v47, %v3070_v32  ;;  %v2298_v55 = vadd.f32 %v2297_v54, %v2296_v49 }
 0x13a   : > { %v2188_v57 = vpop.f32.mrf.mxu0  ;;  %v2299_v59 = vpop.f32.mrf.mxu1 }
 0x13b   : > { %v2189_v58 = vadd.f32 %v2188_v57, %v2187_v51  ;;  %v3166_v60 = vadd.f32 %v2298_v55, %v1123_v52 }
 0x13c   : > { %v2190_v62 = vpop.f32.mrf.mxu0  ;;  %v2300_v1 = vpop.f32.mrf.mxu1 }
 0x13d   : > { %v1126_v63 = vadd.f32 %v2189_v58, %v3070_v32  ;;  %v2301_v2 = vadd.f32 %v2300_v1, %v2299_v59 }
 0x13e   : > { %v2191_v3 = vpop.f32.mrf.mxu0  ;;  %v2302_v6 = vpop.f32.mrf.mxu1 }
 0x13f   : > { %v2192_v4 = vadd.f32 %v2191_v3, %v2190_v62  ;;  %v3169_v7 = vadd.f32 %v2301_v2, %v1126_v63 }
 0x140   : > { %v2193_v9 = vpop.f32.mrf.mxu0  ;;  %v2303_v12 = vpop.f32.mrf.mxu1 }
 0x141   : > { %v1131_v11 = vadd.f32 %v2192_v4, %v3070_v32  ;;  %v2304_v13 = vadd.f32 %v2303_v12, %v2302_v6 }
 0x142   : > { %v2194_v14 = vpop.f32.mrf.mxu0  ;;  %v2305_v17 = vpop.f32.mrf.mxu1 }
 0x143   : > { %v2195_v15 = vadd.f32 %v2194_v14, %v2193_v9  ;;  %v3172_v18 = vadd.f32 %v2304_v13, %v1131_v11 }
 0x144   : > { %v2196_v20 = vpop.f32.mrf.mxu0  ;;  %v2306_v23 = vpop.f32.mrf.mxu1 }
 0x145   : > { %v1134_v22 = vadd.f32 %v2195_v15, %v3070_v32  ;;  %v2307_v24 = vadd.f32 %v2306_v23, %v2305_v17 }
 0x146   : > { %v2197_v25 = vpop.f32.mrf.mxu0  ;;  %v2308_v27 = vpop.f32.mrf.mxu1 }
 0x147   : > { %v2198_v26 = vadd.f32 %v2197_v25, %v2196_v20  ;;  %v3175_v30 = vadd.f32 %v2307_v24, %v1134_v22 }
 0x148   : > { %v2199_v31 = vpop.f32.mrf.mxu0  ;;  %v2309_v35 = vpop.f32.mrf.mxu1 }
 0x149   : > { %v1139_v34 = vadd.f32 %v2198_v26, %v3070_v32  ;;  %v2310_v36 = vadd.f32 %v2309_v35, %v2308_v27 }
 0x14a   : > { %v2200_v37 = vpop.f32.mrf.mxu0  ;;  %v2311_v40 = vpop.f32.mrf.mxu1 }
 0x14b   : > { %v2201_v38 = vadd.f32 %v2200_v37, %v2199_v31  ;;  %v3178_v42 = vadd.f32 %v2310_v36, %v1139_v34 }
 0x14c   : > { %v2202_v43 = vpop.f32.mrf.mxu0  ;;  %v2312_v46 = vpop.f32.mrf.mxu1 }
 0x14d   : > { %v1142_v44 = vadd.f32 %v2201_v38, %v3070_v32  ;;  %v2313_v47 = vadd.f32 %v2312_v46, %v2311_v40 }
 0x14e   : > { %v2203_v49 = vpop.f32.mrf.mxu0  ;;  %v2314_v52 = vpop.f32.mrf.mxu1 }
 0x14f   : > { %v2204_v51 = vadd.f32 %v2203_v49, %v2202_v43  ;;  %v3181_v54 = vadd.f32 %v2313_v47, %v1142_v44 }
 0x150   : > { %v2205_v55 = vpop.f32.mrf.mxu0  ;;  %v2315_v58 = vpop.f32.mrf.mxu1 }
 0x151   : > { %v1147_v57 = vadd.f32 %v2204_v51, %v3070_v32  ;;  %v2316_v59 = vadd.f32 %v2315_v58, %v2314_v52 }
 0x152   : > { %v2206_v62 = vpop.f32.mrf.mxu0  ;;  %v2317_v1 = vpop.f32.mrf.mxu1 }
 0x153   : > { %v2207_v63 = vadd.f32 %v2206_v62, %v2205_v55  ;;  %v3184_v2 = vadd.f32 %v2316_v59, %v1147_v57 }
 0x154   : > { %v2208_v3 = vpop.f32.mrf.mxu0  ;;  %v2318_v6 = vpop.f32.mrf.mxu1 }
 0x155   : > { %v1150_v4 = vadd.f32 %v2207_v63, %v3070_v32  ;;  %v2319_v9 = vadd.f32 %v2318_v6, %v2317_v1 }
 0x156   : > { %v2209_v11 = vpop.f32.mrf.mxu0  ;;  %v2320_v13 = vpop.f32.mrf.mxu1 }
 0x157   : > { %v2210_v12 = vadd.f32 %v2209_v11, %v2208_v3  ;;  %v3187_v14 = vadd.f32 %v2319_v9, %v1150_v4 }
 0x158   : > { %v2211_v15 = vpop.f32.mrf.mxu0  ;;  %v2321_v20 = vpop.f32.mrf.mxu1 }
 0x159   : > { %v1155_v17 = vadd.f32 %v2210_v12, %v3070_v32  ;;  %v2322_v22 = vadd.f32 %v2321_v20, %v2320_v13 }
 0x15a   : > { %v2212_v23 = vpop.f32.mrf.mxu0  ;;  %v2323_v25 = vpop.f32.mrf.mxu1 }
 0x15b   : > { %v2213_v24 = vadd.f32 %v2212_v23, %v2211_v15  ;;  %v3190_v26 = vadd.f32 %v2322_v22, %v1155_v17 }
 0x15c   : > { %v2214_v27 = vpop.f32.mrf.mxu0  ;;  %v2324_v34 = vpop.f32.mrf.mxu1 }
 0x15d   : > { %v1158_v31 = vadd.f32 %v2213_v24, %v3070_v32  ;;  %v2325_v35 = vadd.f32 %v2324_v34, %v2323_v25 }
 0x15e   : > { %v2215_v36 = vpop.f32.mrf.mxu0  ;;  %v2326_v38 = vpop.f32.mrf.mxu1 }
 0x15f   : > { %v2216_v37 = vadd.f32 %v2215_v36, %v2214_v27  ;;  %v3193_v40 = vadd.f32 %v2325_v35, %v1158_v31 }
 0x160   : > { %v2217_v43 = vpop.f32.mrf.mxu0  ;;  %v2327_v46 = vpop.f32.mrf.mxu1 }
 0x161   : > { %v1163_v44 = vadd.f32 %v2216_v37, %v3070_v32  ;;  %v2328_v47 = vadd.f32 %v2327_v46, %v2326_v38 }
 0x162   : > { %v2218_v49 = vpop.f32.mrf.mxu0  ;;  %v2329_v52 = vpop.f32.mrf.mxu1 }
 0x163   : > { %v2219_v51 = vadd.f32 %v2218_v49, %v2217_v43  ;;  %v3196_v55 = vadd.f32 %v2328_v47, %v1163_v44 }
 0x164   : > { %v2220_v57 = vpop.f32.mrf.mxu0  ;;  %v2330_v59 = vpop.f32.mrf.mxu1 }
 0x165   : > { %v1166_v58 = vadd.f32 %v2219_v51, %v3070_v32  ;;  %v2331_v62 = vadd.f32 %v2330_v59, %v2329_v52 }
 0x166   : > { %v2221_v63 = vpop.f32.mrf.mxu0  ;;  %v2332_v3 = vpop.f32.mrf.mxu1 }
 0x167   : > { %v2222_v1 = vadd.f32 %v2221_v63, %v2220_v57  ;;  %v3199_v4 = vadd.f32 %v2331_v62, %v1166_v58 }
 0x168   : > { %v2223_v6 = vpop.f32.mrf.mxu0  ;;  %v2333_v11 = vpop.f32.mrf.mxu1 }
 0x169   : > { %v1171_v9 = vadd.f32 %v2222_v1, %v3070_v32  ;;  %v2334_v12 = vadd.f32 %v2333_v11, %v2332_v3 }
 0x16a   : > { %v2224_v13 = vpop.f32.mrf.mxu0  ;;  %v2335_v17 = vpop.f32.mrf.mxu1 }
 0x16b   : > { %v2225_v15 = vadd.f32 %v2224_v13, %v2223_v6  ;;  %v3202_v20 = vadd.f32 %v2334_v12, %v1171_v9 }
 0x16c   : > { %v2354_v22 = vpop.f32.mrf.mxu0  ;;  %v2336_v24 = vpop.f32.mrf.mxu1 }
 0x16d   : > { %v1174_v23 = vadd.f32 %v2225_v15, %v3070_v32  ;;  %v2337_v25 = vadd.f32 %v2336_v24, %v2335_v17 }
 0x16e   : > { %v2355_v27 = vpop.f32.mrf.mxu0  ;;  %v2495_v34 = vpop.f32.mrf.mxu1 }
 0x16f   : > { %v2356_v31 = vadd.f32 %v2355_v27, %v2354_v22  ;;  %v3205_v35 = vadd.f32 %v2337_v25, %v1174_v23 }
 0x170   : > { %v2357_v36 = vpop.f32.mrf.mxu0  ;;  %v1533_v38 = vpop.f32.mrf.mxu1 }
 0x171   : > { %v1373_v37 = vadd.f32 %v2356_v31, %v3078_v48 }
 0x172   : > { %v2358_v43 = vpop.f32.mrf.mxu0  ;;  %v2496_v46 = vpop.f32.mrf.mxu1 }
 0x173   : > { %v2359_v44 = vadd.f32 %v2358_v43, %v2357_v36  ;;  %v1534_v49 = vadd.f32 %v1533_v38, %v1373_v37 }
 0x174   : > { %v2360_v47 = vpop.f32.mrf.mxu0  ;;  %v1536_v52 = vpop.f32.mrf.mxu1 }
 0x175   : > { %v1376_v51 = vadd.f32 %v2359_v44, %v3088_v61  ;;  %v1660_v63 = vmax.f32 %v1534_v49, 0.0 }
 0x176   : > { %v2361_v32 = vpop.f32.mrf.mxu0  ;;  %v2499_v62 = vpop.f32.mrf.mxu1 }
 0x177   : > { %v2362_v57 = vadd.f32 %v2361_v32, %v2360_v47  ;;  %v1537_v58 = vadd.f32 %v1536_v52, %v1376_v51 }
 0x178   : > { %v2363_v59 = vpop.f32.mrf.mxu0  ;;  %v1549_v12 = vpop.f32.mrf.mxu1 }
 0x179   : > { %v1381_v1 = vadd.f32 %v2362_v57, %v3094_v8  ;;  %v1661_v3 = vmax.f32 %v1537_v58, 0.0 }
 0x17a   : > { %v2364_v6 = vpop.f32.mrf.mxu0  ;;  %v2500_v24 = vpop.f32.mrf.mxu1 }
 0x17b   : > { %v1692_v48 = vpack.c.bf16 %v1661_v3, %v1660_v63  ;;  %v2365_v9 = vadd.f32 %v2364_v6, %v2363_v59  ;;  %v1542_v13 = vadd.f32 %v2495_v34, %v1381_v1 }
 0x17c   : > { %v2366_v11 = vpop.f32.mrf.mxu0  ;;  %v1552_v43 = vpop.f32.mrf.mxu1 }
 0x17d   : > { %v1384_v15 = vadd.f32 %v2365_v9, %v3104_v21  ;;  %2541 = vmatprep.mubr.bf16.mxu1 %v1692_v48  ;;  %v1662_v25 = vmax.f32 %v1542_v13, 0.0 }
 0x17e   : > { %v2367_v61 = vpop.f32.mrf.mxu0  ;;  %v2503_v51 = vpop.f32.mrf.mxu1 }
 0x17f   : > { %v1545_v17 = vadd.f32 %v2496_v46, %v1384_v15  ;;  %v2368_v22 = vadd.f32 %v2367_v61, %v2366_v11 }
 0x180   : > { %v2369_v23 = vpop.f32.mrf.mxu0  ;;  %v1565_v1 = vpop.f32.mrf.mxu1 }
 0x181   : > { %v1663_v27 = vmax.f32 %v1545_v17, 0.0  ;;  %v1389_v31 = vadd.f32 %v2368_v22, %v3110_v33 }
 0x182   : > { %v2370_v8 = vpop.f32.mrf.mxu0 }
 0x183   : > { %v1693_v36 = vpack.c.bf16 %v1663_v27, %v1662_v25  ;;  %v2371_v37 = vadd.f32 %v2370_v8, %v2369_v23  ;;  %v1550_v44 = vadd.f32 %v1549_v12, %v1389_v31  ;;  %v2504_v12 = vpop.f32.mrf.mxu1 }
 0x184   : > { %v2372_v38 = vpop.f32.mrf.mxu0 }
 0x185   : > { %2542 = vmatmul.mubr.bf16.vlgmr.msra.gmra.mxu1 %v1693_v36  ;;  %v1392_v34 = vadd.f32 %v2371_v37, %v3117_v45  ;;  %v1664_v52 = vmax.f32 %v1550_v44, 0.0  ;;  %v1568_v25 = vpop.f32.mrf.mxu1 }
 0x186   : > { %v2373_v21 = vpop.f32.mrf.mxu0 }
 0x187   : > { %v2374_v47 = vadd.f32 %v2373_v21, %v2372_v38  ;;  %v1553_v49 = vadd.f32 %v1552_v43, %v1392_v34  ;;  %v2507_v36 = vpop.f32.mrf.mxu1 }
 0x188   : > { %v2375_v46 = vpop.f32.mrf.mxu0 }
 0x189   : > { %v1397_v32 = vadd.f32 %v2374_v47, %v3120_v56  ;;  %v1665_v57 = vmax.f32 %v1553_v49, 0.0  ;;  %v1581_v47 = vpop.f32.mrf.mxu1 }
 0x18a   : > { %v2376_v58 = vpop.f32.mrf.mxu0 }
 0x18b   : > { %v1694_v33 = vpack.c.bf16 %v1665_v57, %v1664_v52  ;;  %v2377_v59 = vadd.f32 %v2376_v58, %v2375_v46  ;;  %v1558_v3 = vadd.f32 %v2499_v62, %v1397_v32  ;;  %v2508_v58 = vpop.f32.mrf.mxu1 }
 0x18c   : > { %v2378_v63 = vpop.f32.mrf.mxu0 }
 0x18d   : > { %v1400_v6 = vadd.f32 %v2377_v59, %v3127_v5  ;;  %2545 = vmatprep.mubr.bf16.mxu1 %v1694_v33  ;;  %v1666_v13 = vmax.f32 %v1558_v3, 0.0 }
 0x18e   : > { %v2379_v48 = vpop.f32.mrf.mxu0 }
 0x18f   : > { %v1561_v45 = vadd.f32 %v2500_v24, %v1400_v6  ;;  %v2380_v9 = vadd.f32 %v2379_v48, %v2378_v63  ;;  %v1584_v48 = vpop.f32.mrf.mxu1 }
 0x190   : > { %v2381_v11 = vpop.f32.mrf.mxu0 }
 0x191   : > { %v1667_v15 = vmax.f32 %v1561_v45, 0.0  ;;  %v1405_v61 = vadd.f32 %v2380_v9, %v3130_v16 }
 0x192   : > { %v2382_v56 = vpop.f32.mrf.mxu0 }
 0x193   : > { %v2383_v17 = vadd.f32 %v2382_v56, %v2381_v11  ;;  %v1695_v22 = vpack.c.bf16 %v1667_v15, %v1666_v13  ;;  %v1566_v27 = vadd.f32 %v1565_v1, %v1405_v61  ;;  %v2511_v13 = vpop.f32.mrf.mxu1 }
 0x194   : > { %v2384_v23 = vpop.f32.mrf.mxu0 }
 0x195   : > { %2546 = vmatmul.mubr.bf16.gmra.mxu1 %v1695_v22  ;;  %v1408_v62 = vadd.f32 %v2383_v17, %v3137_v29  ;;  %v1668_v37 = vmax.f32 %v1566_v27, 0.0 }
 0x196   : > { %v2385_v5 = vpop.f32.mrf.mxu0 }
 0x197   : > { %v2386_v31 = vadd.f32 %v2385_v5, %v2384_v23  ;;  %v1569_v8 = vadd.f32 %v1568_v25, %v1408_v62  ;;  %v1597_v25 = vpop.f32.mrf.mxu1 }
 0x198   : > { %v2387_v24 = vpop.f32.mrf.mxu0 }
 0x199   : > { %v1413_v38 = vadd.f32 %v2386_v31, %v3140_v41  ;;  %v1669_v43 = vmax.f32 %v1569_v8, 0.0 }
 0x19a   : > { %v2388_v44 = vpop.f32.mrf.mxu0 }
 0x19b   : > { %v1696_v16 = vpack.c.bf16 %v1669_v43, %v1668_v37  ;;  %v2389_v34 = vadd.f32 %v2388_v44, %v2387_v24  ;;  %v1574_v49 = vadd.f32 %v2503_v51, %v1413_v38  ;;  %v2512_v24 = vpop.f32.mrf.mxu1 }
 0x19c   : > { %v2390_v21 = vpop.f32.mrf.mxu0 }
 0x19d   : > { %v1416_v46 = vadd.f32 %v2389_v34, %v3145_v53  ;;  %2549 = vmatprep.mubr.bf16.mxu1 %v1696_v16  ;;  %v1670_v33 = vmax.f32 %v1574_v49, 0.0 }
 0x19e   : > { %v2391_v52 = vpop.f32.mrf.mxu0 }
 0x19f   : > { %v1577_v29 = vadd.f32 %v2504_v12, %v1416_v46  ;;  %v2392_v32 = vadd.f32 %v2391_v52, %v2390_v21  ;;  %v1600_v21 = vpop.f32.mrf.mxu1 }
 0x1a0   : > { %v2393_v57 = vpop.f32.mrf.mxu0 }
 0x1a1   : > { %v1671_v59 = vmax.f32 %v1577_v29, 0.0  ;;  %v1421_v63 = vadd.f32 %v2392_v32, %v3148_v0  ;;  %v2515_v29 = vpop.f32.mrf.mxu1 }
 0x1a2   : > { %v2394_v41 = vpop.f32.mrf.mxu0 }
 0x1a3   : > { %v2395_v1 = vadd.f32 %v2394_v41, %v2393_v57  ;;  %v1697_v3 = vpack.c.bf16 %v1671_v59, %v1670_v33  ;;  %v1582_v45 = vadd.f32 %v1581_v47, %v1421_v63  ;;  %v1613_v41 = vpop.f32.mrf.mxu1 }
 0x1a4   : > { %v2396_v6 = vpop.f32.mrf.mxu0 }
 0x1a5   : > { %2550 = vmatmul.mubr.bf16.gmra.mxu1 %v1697_v3  ;;  %v1424_v51 = vadd.f32 %v2395_v1, %v3151_v10  ;;  %v1672_v15 = vmax.f32 %v1582_v45, 0.0 }
 0x1a6   : > { %v2397_v53 = vpop.f32.mrf.mxu0 }
 0x1a7   : > { %v2398_v9 = vadd.f32 %v2397_v53, %v2396_v6  ;;  %v1585_v11 = vadd.f32 %v1584_v48, %v1424_v51  ;;  %v2516_v51 = vpop.f32.mrf.mxu1 }
 0x1a8   : > { %v2399_v12 = vpop.f32.mrf.mxu0 }
 0x1a9   : > { %v1429_v61 = vadd.f32 %v2398_v9, %v3154_v19  ;;  %v1673_v56 = vmax.f32 %v1585_v11, 0.0 }
 0x1aa   : > { %v2400_v17 = vpop.f32.mrf.mxu0 }
 0x1ab   : > { %v1698_v0 = vpack.c.bf16 %v1673_v56, %v1672_v15  ;;  %v2401_v22 = vadd.f32 %v2400_v17, %v2399_v12  ;;  %v1590_v27 = vadd.f32 %v2507_v36, %v1429_v61  ;;  %v1616_v56 = vpop.f32.mrf.mxu1 }
 0x1ac   : > { %v2402_v23 = vpop.f32.mrf.mxu0 }
 0x1ad   : > { %v1432_v62 = vadd.f32 %v2401_v22, %v3157_v28  ;;  %2553 = vmatprep.mubr.bf16.mxu1 %v1698_v0  ;;  %v1674_v37 = vmax.f32 %v1590_v27, 0.0 }
 0x1ae   : > { %v2403_v5 = vpop.f32.mrf.mxu0 }
 0x1af   : > { %v1593_v10 = vadd.f32 %v2508_v58, %v1432_v62  ;;  %v2404_v31 = vadd.f32 %v2403_v5, %v2402_v23 }
 0x1b0   : > { %v2405_v8 = vpop.f32.mrf.mxu0 }
 0x1b1   : > { %v1675_v38 = vmax.f32 %v1593_v10, 0.0  ;;  %v1437_v43 = vadd.f32 %v2404_v31, %v3160_v39 }
 0x1b2   : > { %v2406_v19 = vpop.f32.mrf.mxu0 }
 0x1b3   : > { %v2407_v44 = vadd.f32 %v2406_v19, %v2405_v8  ;;  %v1699_v16 = vpack.c.bf16 %v1675_v38, %v1674_v37  ;;  %v1598_v47 = vadd.f32 %v1597_v25, %v1437_v43  ;;  %v2519_v25 = vpop.f32.mrf.mxu1 }
 0x1b4   : > { %v2408_v34 = vpop.f32.mrf.mxu0 }
 0x1b5   : > { %2554 = vmatmul.mubr.bf16.gmra.mxu1 %v1699_v16  ;;  %v1440_v36 = vadd.f32 %v2407_v44, %v3163_v50  ;;  %v1676_v32 = vmax.f32 %v1598_v47, 0.0 }
 0x1b6   : > { %v2409_v28 = vpop.f32.mrf.mxu0 }
 0x1b7   : > { %v2410_v49 = vadd.f32 %v2409_v28, %v2408_v34  ;;  %v1601_v46 = vadd.f32 %v1600_v21, %v1440_v36 }
 0x1b8   : > { %v2411_v52 = vpop.f32.mrf.mxu0 }
 0x1b9   : > { %v1445_v57 = vadd.f32 %v2410_v49, %v3166_v60  ;;  %v1677_v58 = vmax.f32 %v1601_v46, 0.0 }
 0x1ba   : > { %v2412_v33 = vpop.f32.mrf.mxu0 }
 0x1bb   : > { %v1700_v39 = vpack.c.bf16 %v1677_v58, %v1676_v32  ;;  %v2413_v59 = vadd.f32 %v2412_v33, %v2411_v52  ;;  %v1606_v1 = vadd.f32 %v2511_v13, %v1445_v57 }
 0x1bc   : > { %v2414_v63 = vpop.f32.mrf.mxu0 }
 0x1bd   : > { %v1448_v3 = vadd.f32 %v2413_v59, %v3169_v7  ;;  %2557 = vmatprep.mubr.bf16.mxu1 %v1700_v39  ;;  %v1678_v53 = vmax.f32 %v1606_v1, 0.0 }
 0x1be   : > { %v2415_v6 = vpop.f32.mrf.mxu0 }
 0x1bf   : > { %v1609_v50 = vadd.f32 %v2512_v24, %v1448_v3  ;;  %v2416_v48 = vadd.f32 %v2415_v6, %v2414_v63  ;;  %v1629_v24 = vpop.f32.mrf.mxu1 }
 0x1c0   : > { %v2417_v45 = vpop.f32.mrf.mxu0 }
 0x1c1   : > { %v1679_v9 = vmax.f32 %v1609_v50, 0.0  ;;  %v1453_v11 = vadd.f32 %v2416_v48, %v3172_v18  ;;  %v2520_v16 = vpop.f32.mrf.mxu1 }
 0x1c2   : > { %v2418_v60 = vpop.f32.mrf.mxu0 }
 0x1c3   : > { %v1701_v12 = vpack.c.bf16 %v1679_v9, %v1678_v53  ;;  %v2419_v15 = vadd.f32 %v2418_v60, %v2417_v45  ;;  %v1614_v17 = vadd.f32 %v1613_v41, %v1453_v11  ;;  %v1632_v46 = vpop.f32.mrf.mxu1 }
 0x1c4   : > { %v2420_v61 = vpop.f32.mrf.mxu0 }
 0x1c5   : > { %2558 = vmatmul.mubr.bf16.gmra.mxu1 %v1701_v12  ;;  %v1456_v13 = vadd.f32 %v2419_v15, %v3175_v30  ;;  %v1680_v27 = vmax.f32 %v1614_v17, 0.0  ;;  %v2523_v33 = vpop.f32.mrf.mxu1 }
 0x1c6   : > { %v2421_v7 = vpop.f32.mrf.mxu0 }
 0x1c7   : > { %v2422_v0 = vadd.f32 %v2421_v7, %v2420_v61  ;;  %v1617_v22 = vadd.f32 %v1616_v56, %v1456_v13  ;;  %v1645_v6 = vpop.f32.mrf.mxu1 }
 0x1c8   : > { %v2423_v23 = vpop.f32.mrf.mxu0 }
 0x1c9   : > { %v1461_v62 = vadd.f32 %v2422_v0, %v3178_v42  ;;  %v1681_v5 = vmax.f32 %v1617_v22, 0.0  ;;  %v2524_v9 = vpop.f32.mrf.mxu1 }
 0x1ca   : > { %v2424_v10 = vpop.f32.mrf.mxu0 }
 0x1cb   : > { %v1702_v18 = vpack.c.bf16 %v1681_v5, %v1680_v27  ;;  %v2425_v31 = vadd.f32 %v2424_v10, %v2423_v23  ;;  %v1622_v37 = vadd.f32 %v2515_v29, %v1461_v62  ;;  %v1648_v17 = vpop.f32.mrf.mxu1 }
 0x1cc   : > { %v2426_v8 = vpop.f32.mrf.mxu0 }
 0x1cd   : > { %v1464_v38 = vadd.f32 %v2425_v31, %v3181_v54  ;;  %2561 = vmatprep.mubr.bf16.mxu1 %v1702_v18  ;;  %v1682_v34 = vmax.f32 %v1622_v37, 0.0 }
 0x1ce   : > { %v2427_v43 = vpop.f32.mrf.mxu0 }
 0x1cf   : > { %v1625_v30 = vadd.f32 %v2516_v51, %v1464_v38  ;;  %v2428_v19 = vadd.f32 %v2427_v43, %v2426_v8  ;;  %v3243_v38 = vld [vmem:[%s3321_s4] ss:$0 sm:$0xff] }
 0x1d0   : > { %v2429_v44 = vpop.f32.mrf.mxu0 }
 0x1d1   : > { %v1683_v21 = vmax.f32 %v1625_v30, 0.0  ;;  %v1469_v47 = vadd.f32 %v2428_v19, %v3184_v2 }
 0x1d2   : > { %v2430_v42 = vpop.f32.mrf.mxu0 }
 0x1d3   : > { %v1703_v36 = vpack.c.bf16 %v1683_v21, %v1682_v34  ;;  %v2431_v28 = vadd.f32 %v2430_v42, %v2429_v44  ;;  %v1630_v52 = vadd.f32 %v1629_v24, %v1469_v47 }
 0x1d4   : > { %v2432_v49 = vpop.f32.mrf.mxu0 }
 0x1d5   : > { %2562 = vmatmul.mubr.bf16.gmra.mxu1 %v1703_v36  ;;  %v1472_v29 = vadd.f32 %v2431_v28, %v3187_v14  ;;  %v1684_v39 = vmax.f32 %v1630_v52, 0.0 }
 0x1d6   : > { %v2433_v54 = vpop.f32.mrf.mxu0 }
 0x1d7   : > { %v2434_v32 = vadd.f32 %v2433_v54, %v2432_v49  ;;  %v1633_v57 = vadd.f32 %v1632_v46, %v1472_v29 }
 0x1d8   : > { %v2435_v58 = vpop.f32.mrf.mxu0 }
 0x1d9   : > { %v1477_v59 = vadd.f32 %v2434_v32, %v3190_v26  ;;  %v1685_v63 = vmax.f32 %v1633_v57, 0.0 }
 0x1da   : > { %v2436_v41 = vpop.f32.mrf.mxu0 }
 0x1db   : > { %v1704_v2 = vpack.c.bf16 %v1685_v63, %v1684_v39  ;;  %v2437_v1 = vadd.f32 %v2436_v41, %v2435_v58  ;;  %v1638_v50 = vadd.f32 %v2519_v25, %v1477_v59 }
 0x1dc   : > { %v2438_v3 = vpop.f32.mrf.mxu0 }
 0x1dd   : > { %v1480_v48 = vadd.f32 %v2437_v1, %v3193_v40  ;;  %2565 = vmatprep.mubr.bf16.mxu1 %v1704_v2  ;;  %v1686_v11 = vmax.f32 %v1638_v50, 0.0 }
 0x1de   : > { %v2439_v45 = vpop.f32.mrf.mxu0 }
 0x1df   : > { %v1641_v14 = vadd.f32 %v2520_v16, %v1480_v48  ;;  %v2440_v51 = vadd.f32 %v2439_v45, %v2438_v3 }
 0x1e0   : > { %v2441_v53 = vpop.f32.mrf.mxu0 }
 0x1e1   : > { %v1687_v60 = vmax.f32 %v1641_v14, 0.0  ;;  %v1485_v12 = vadd.f32 %v2440_v51, %v3196_v55 }
 0x1e2   : > { %v2442_v26 = vpop.f32.mrf.mxu0 }
 0x1e3   : > { %v1705_v15 = vpack.c.bf16 %v1687_v60, %v1686_v11  ;;  %v2443_v61 = vadd.f32 %v2442_v26, %v2441_v53  ;;  %v1646_v13 = vadd.f32 %v1645_v6, %v1485_v12 }
 0x1e4   : > { %v2444_v56 = vpop.f32.mrf.mxu0 }
 0x1e5   : > { %2566 = vmatmul.mubr.bf16.gmra.mxu1 %v1705_v15  ;;  %v1488_v7 = vadd.f32 %v2443_v61, %v3199_v4  ;;  %v1688_v25 = vmax.f32 %v1646_v13, 0.0 }
 0x1e6   : > { %v2445_v40 = vpop.f32.mrf.mxu0 }
 0x1e7   : > { %v2446_v0 = vadd.f32 %v2445_v40, %v2444_v56  ;;  %v1649_v22 = vadd.f32 %v1648_v17, %v1488_v7 }
 0x1e8   : > { %v2447_v23 = vpop.f32.mrf.mxu0 }
 0x1e9   : > { %v1493_v27 = vadd.f32 %v2446_v0, %v3202_v20  ;;  %v1689_v62 = vmax.f32 %v1649_v22, 0.0 }
 0x1ea   : > { %v2448_v5 = vpop.f32.mrf.mxu0 }
 0x1eb   : > { %v1706_v55 = vpack.c.bf16 %v1689_v62, %v1688_v25  ;;  %v2449_v10 = vadd.f32 %v2448_v5, %v2447_v23  ;;  %v1654_v18 = vadd.f32 %v2523_v33, %v1493_v27 }
 0x1ed   : > { %v1496_v31 = vadd.f32 %v2449_v10, %v3205_v35  ;;  %2569 = vmatprep.mubr.bf16.mxu1 %v1706_v55  ;;  %v1690_v24 = vmax.f32 %v1654_v18, 0.0 }
 0x1ef   : > { %v1657_v8 = vadd.f32 %v2524_v9, %v1496_v31 }
 0x1f1   : > { %v1691_v37 = vmax.f32 %v1657_v8, 0.0 }
 0x1f3   : > { %v1707_v4 = vpack.c.bf16 %v1691_v37, %v1690_v24 }
 0x1f5   : > { %2570 = vmatmul.mubr.bf16.gmra.mxu1 %v1707_v4 }
 0x245   : > { %v2543_v20 = vpop.f32.mrf.mxu1 }
 0x246   : > { %v1822_v35 = vadd.f32 %v2543_v20, %v3243_v38 }
 0x247   : > { %v1813_v43 = vpop.f32.mrf.mxu1 }
 0x248   : > { %1942 = vst [vmem:[%s3248_s7 + $0x10] sm:$0xff] %v1822_v35  ;;  %v1814_v30 = vadd.f32 %v3243_v38, %v1813_v43 }
 0x249   : > { %v2544_v19 = vpop.f32.mrf.mxu1 }
 0x24a   : > { %1940 = vst [vmem:[%s3248_s7] sm:$0xff] %v1814_v30  ;;  %v1825_v44 = vadd.f32 %v2544_v19, %v3243_v38 }
 0x24b   : > { %v1816_v16 = vpop.f32.mrf.mxu1 }
 0x24c   : > { %1943 = vst [vmem:[%s3248_s7 + $0x18] sm:$0xff] %v1825_v44  ;;  %v1817_v34 = vadd.f32 %v3243_v38, %v1816_v16 }
 0x24e   : > { %1941 = vst [vmem:[%s3248_s7 + $0x8] sm:$0xff] %v1817_v34 }
 0x255   : > { %v2547_v21 = vpop.f32.mrf.mxu1 }
 0x256   : > { %v1838_v47 = vadd.f32 %v2547_v21, %v3243_v38 }
 0x257   : > { %v1829_v42 = vpop.f32.mrf.mxu1 }
 0x258   : > { %1946 = vst [vmem:[%s3248_s7 + $0x30] sm:$0xff] %v1838_v47  ;;  %v1830_v36 = vadd.f32 %v3243_v38, %v1829_v42 }
 0x259   : > { %v2548_v28 = vpop.f32.mrf.mxu1 }
 0x25a   : > { %1944 = vst [vmem:[%s3248_s7 + $0x20] sm:$0xff] %v1830_v36  ;;  %v1841_v49 = vadd.f32 %v2548_v28, %v3243_v38 }
 0x25b   : > { %v1832_v46 = vpop.f32.mrf.mxu1 }
 0x25c   : > { %1947 = vst [vmem:[%s3248_s7 + $0x38] sm:$0xff] %v1841_v49  ;;  %v1833_v52 = vadd.f32 %v3243_v38, %v1832_v46 }
 0x25e   : > { %1945 = vst [vmem:[%s3248_s7 + $0x28] sm:$0xff] %v1833_v52 }
 0x265   : > { %v2551_v29 = vpop.f32.mrf.mxu1 }
 0x266   : > { %v1854_v54 = vadd.f32 %v2551_v29, %v3243_v38 }
 0x267   : > { %v1845_v32 = vpop.f32.mrf.mxu1 }
 0x268   : > { %1950 = vst [vmem:[%s3248_s7 + $0x50] sm:$0xff] %v1854_v54  ;;  %v1846_v57 = vadd.f32 %v3243_v38, %v1845_v32 }
 0x269   : > { %v2552_v58 = vpop.f32.mrf.mxu1 }
 0x26a   : > { %1948 = vst [vmem:[%s3248_s7 + $0x40] sm:$0xff] %v1846_v57  ;;  %v1857_v33 = vadd.f32 %v2552_v58, %v3243_v38 }
 0x26b   : > { %v1848_v39 = vpop.f32.mrf.mxu1 }
 0x26c   : > { %1951 = vst [vmem:[%s3248_s7 + $0x58] sm:$0xff] %v1857_v33  ;;  %v1849_v59 = vadd.f32 %v3243_v38, %v1848_v39 }
 0x26e   : > { %1949 = vst [vmem:[%s3248_s7 + $0x48] sm:$0xff] %v1849_v59 }
 0x275   : > { %v2555_v63 = vpop.f32.mrf.mxu1 }
 0x276   : > { %v1870_v41 = vadd.f32 %v2555_v63, %v3243_v38 }
 0x277   : > { %v1861_v2 = vpop.f32.mrf.mxu1 }
 0x278   : > { %1954 = vst [vmem:[%s3248_s7 + $0x70] sm:$0xff] %v1870_v41  ;;  %v1862_v1 = vadd.f32 %v3243_v38, %v1861_v2 }
 0x279   : > { %v2556_v3 = vpop.f32.mrf.mxu1 }
 0x27a   : > { %1952 = vst [vmem:[%s3248_s7 + $0x60] sm:$0xff] %v1862_v1  ;;  %v1873_v6 = vadd.f32 %v2556_v3, %v3243_v38 }
 0x27b   : > { %v1864_v50 = vpop.f32.mrf.mxu1 }
 0x27c   : > { %1955 = vst [vmem:[%s3248_s7 + $0x78] sm:$0xff] %v1873_v6  ;;  %v1865_v48 = vadd.f32 %v3243_v38, %v1864_v50 }
 0x27e   : > { %1953 = vst [vmem:[%s3248_s7 + $0x68] sm:$0xff] %v1865_v48 }
 0x285   : > { %v2559_v45 = vpop.f32.mrf.mxu1 }
 0x286   : > { %v1886_v14 = vadd.f32 %v2559_v45, %v3243_v38 }
 0x287   : > { %v1877_v51 = vpop.f32.mrf.mxu1 }
 0x288   : > { %1958 = vst [vmem:[%s3248_s7 + $0x90] sm:$0xff] %v1886_v14  ;;  %v1878_v53 = vadd.f32 %v3243_v38, %v1877_v51 }
 0x289   : > { %v2560_v9 = vpop.f32.mrf.mxu1 }
 0x28a   : > { %1956 = vst [vmem:[%s3248_s7 + $0x80] sm:$0xff] %v1878_v53  ;;  %v1889_v11 = vadd.f32 %v2560_v9, %v3243_v38 }
 0x28b   : > { %v1880_v60 = vpop.f32.mrf.mxu1 }
 0x28c   : > { %1959 = vst [vmem:[%s3248_s7 + $0x98] sm:$0xff] %v1889_v11  ;;  %v1881_v12 = vadd.f32 %v3243_v38, %v1880_v60 }
 0x28e   : > { %1957 = vst [vmem:[%s3248_s7 + $0x88] sm:$0xff] %v1881_v12 }
 0x295   : > { %v2563_v26 = vpop.f32.mrf.mxu1 }
 0x296   : > { %v1902_v15 = vadd.f32 %v2563_v26, %v3243_v38 }
 0x297   : > { %v1893_v61 = vpop.f32.mrf.mxu1 }
 0x298   : > { %1962 = vst [vmem:[%s3248_s7 + $0xb0] sm:$0xff] %v1902_v15  ;;  %v1894_v56 = vadd.f32 %v3243_v38, %v1893_v61 }
 0x299   : > { %v2564_v17 = vpop.f32.mrf.mxu1 }
 0x29a   : > { %1960 = vst [vmem:[%s3248_s7 + $0xa0] sm:$0xff] %v1894_v56  ;;  %v1905_v13 = vadd.f32 %v2564_v17, %v3243_v38 }
 0x29b   : > { %v1896_v7 = vpop.f32.mrf.mxu1 }
 0x29c   : > { %1963 = vst [vmem:[%s3248_s7 + $0xb8] sm:$0xff] %v1905_v13  ;;  %v1897_v40 = vadd.f32 %v3243_v38, %v1896_v7 }
 0x29e   : > { %1961 = vst [vmem:[%s3248_s7 + $0xa8] sm:$0xff] %v1897_v40 }
 0x2a5   : > { %v2567_v0 = vpop.f32.mrf.mxu1 }
 0x2a6   : > { %v1918_v22 = vadd.f32 %v2567_v0, %v3243_v38 }
 0x2a7   : > { %v1909_v23 = vpop.f32.mrf.mxu1 }
 0x2a8   : > { %1966 = vst [vmem:[%s3248_s7 + $0xd0] sm:$0xff] %v1918_v22  ;;  %v1910_v25 = vadd.f32 %v3243_v38, %v1909_v23 }
 0x2a9   : > { %v2568_v27 = vpop.f32.mrf.mxu1 }
 0x2aa   : > { %1964 = vst [vmem:[%s3248_s7 + $0xc0] sm:$0xff] %v1910_v25  ;;  %v1921_v62 = vadd.f32 %v2568_v27, %v3243_v38 }
 0x2ab   : > { %v1912_v5 = vpop.f32.mrf.mxu1 }
 0x2ac   : > { %1967 = vst [vmem:[%s3248_s7 + $0xd8] sm:$0xff] %v1921_v62  ;;  %v1913_v55 = vadd.f32 %v3243_v38, %v1912_v5 }
 0x2ae   : > { %1965 = vst [vmem:[%s3248_s7 + $0xc8] sm:$0xff] %v1913_v55 }
 0x2b5   : > { %v2571_v10 = vpop.f32.mrf.mxu1 }
 0x2b6   : > { %v1934_v18 = vadd.f32 %v2571_v10, %v3243_v38 }
 0x2b7   : > { %v1925_v31 = vpop.f32.mrf.mxu1 }
 0x2b8   : > { %1970 = vst [vmem:[%s3248_s7 + $0xf0] sm:$0xff] %v1934_v18  ;;  %v1926_v8 = vadd.f32 %v3243_v38, %v1925_v31 }
 0x2b9   : > { %v2572_v24 = vpop.f32.mrf.mxu1 }
 0x2ba   : > { %1968 = vst [vmem:[%s3248_s7 + $0xe0] sm:$0xff] %v1926_v8  ;;  %v1937_v37 = vadd.f32 %v2572_v24, %v3243_v38 }
 0x2bb   : > { %v1928_v4 = vpop.f32.mrf.mxu1 }
 0x2bc   : > { %1971 = vst [vmem:[%s3248_s7 + $0xf8] sm:$0xff] %v1937_v37  ;;  %v1929_v20 = vadd.f32 %v3243_v38, %v1928_v4 }
 0x2be   : > { %1969 = vst [vmem:[%s3248_s7 + $0xe8] sm:$0xff] %v1929_v20 }
 0x2bf PF: > { %s15_s18 = sadd.s32 1, %s2645_s18  }
 0x2c0   : > { %p12_p4 = scmp.ge.s32.totalorder %s15_s18, 4  }
 0x2c2   :  { %14 = sbr.rel (!%p12_p4) target bundleno = 1 (0x1), region = 70 }

</bundles_post_ra>
